<compile_context>
chip_gen: v5e
topology: v5e:2x2
jax: 0.10.0
libtpu: 0.0.40
codegen_flags: <defaults>
</compile_context>

<pallas_src>
import functools
from math import sqrt

import jax
import jax.numpy as jnp
from jax import lax
from jax.experimental import pallas as pl
from jax.experimental.pallas import tpu as pltpu


# ------------------------------ config -------------------------------------
HIDDEN = 32          # hidden_channels
INT_EMB = 16         # int_emb_size
BASIS_DIST = 8       # basis_emb_size_dist
BASIS_ANGLE = 8      # basis_emb_size_angle
BASIS_TORSION = 8    # basis_emb_size_torsion
NUM_SPH = 4          # num_spherical
NUM_RAD = 8          # num_radial
NUM_BEFORE = 1       # num_before_skip
NUM_AFTER = 2        # num_after_skip

E = 16               # number of edges  (rows of x1)
T = 24               # number of triplets (rows of sbf / torsion emb)


def swish(x):
    return x * jax.nn.sigmoid(x)


# ------------------------------ fused kernel --------------------------------
def fused_update_e_kernel(x1_ref, rbf0_ref, sbf_ref, tor_ref,
                          idx_kj_ref, idx_ji_ref,
                          w_jikj_ref, b_jikj_ref, w_rbfcat_ref,
                          w_down_ref, w_sbf1_ref, w_sbf2_ref,
                          w_t1_ref, w_t2_ref, w_up_ref,
                          w_lin_ref, b_lin_ref,
                          w_res1_ref, b_res1_ref, w_res2_ref, b_res2_ref,
                          out_ref, *, num_before):
    nE, H = x1_ref.shape
    nT = sbf_ref.shape[0]

    x1 = x1_ref[...]

    # ----- per-edge projections (lin_ji | lin_kj fused into one matmul) -----
    xjk = swish(jnp.dot(x1, w_jikj_ref[...], preferred_element_type=jnp.float32)
                + b_jikj_ref[...])                                 # (E, 2H)
    x_ji = xjk[:, :H]
    x_kj = xjk[:, H:]

    # ----- rbf projections: [lin_rbf1@lin_rbf2 | lin_rbf] in one matmul -----
    rbfs = jnp.dot(rbf0_ref[...], w_rbfcat_ref[...],
                   preferred_element_type=jnp.float32)             # (E, 2H)
    rbf_h = rbfs[:, :H]                                            # gates x_kj
    rbf_gate = rbfs[:, H:]                                         # gates e2

    x_kj = x_kj * rbf_h
    x_kj = swish(jnp.dot(x_kj, w_down_ref[...],
                         preferred_element_type=jnp.float32))      # (E, I)

    # ----- triplet path: sbf / torsion projections -----
    sbf = jnp.dot(sbf_ref[...], w_sbf1_ref[...],
                  preferred_element_type=jnp.float32)
    sbf = jnp.dot(sbf, w_sbf2_ref[...], preferred_element_type=jnp.float32)

    tor = jnp.dot(tor_ref[...], w_t1_ref[...],
                  preferred_element_type=jnp.float32)
    tor = jnp.dot(tor, w_t2_ref[...], preferred_element_type=jnp.float32)

    # gather x_kj[idx_kj] as a one-hot (T, E) matmul (MXU-friendly on TPU)
    cols = lax.broadcasted_iota(jnp.int32, (nT, nE), 1)
    gather_oh = (idx_kj_ref[...] == cols).astype(jnp.float32)      # (T, E)
    gathered = jnp.dot(gather_oh, x_kj,
                       preferred_element_type=jnp.float32)         # (T, I)

    msg = gathered * sbf * tor                                     # (T, I)

    # scatter-add over idx_ji as a one-hot (E, T) matmul
    rows = lax.broadcasted_iota(jnp.int32, (nE, nT), 0)
    scatter_oh = (rows == idx_ji_ref[...]).astype(jnp.float32)     # (E, T)
    scat = jnp.dot(scatter_oh, msg,
                   preferred_element_type=jnp.float32)             # (E, I)

    # ----- output stage -----
    x_kj_up = swish(jnp.dot(scat, w_up_ref[...],
                            preferred_element_type=jnp.float32))   # (E, H)
    e1 = x_ji + x_kj_up

    n_res = w_res1_ref.shape[0]
    for l in range(num_before):                  # layers_before_skip (unrolled)
        h = swish(jnp.dot(e1, w_res1_ref[l],
                          preferred_element_type=jnp.float32) + b_res1_ref[l])
        h = swish(jnp.dot(h, w_res2_ref[l],
                          preferred_element_type=jnp.float32) + b_res2_ref[l])
        e1 = e1 + h

    e1 = swish(jnp.dot(e1, w_lin_ref[...],
                       preferred_element_type=jnp.float32) + b_lin_ref[...]) + x1

    for l in range(num_before, n_res):           # layers_after_skip (unrolled)
        h = swish(jnp.dot(e1, w_res1_ref[l],
                          preferred_element_type=jnp.float32) + b_res1_ref[l])
        h = swish(jnp.dot(h, w_res2_ref[l],
                          preferred_element_type=jnp.float32) + b_res2_ref[l])
        e1 = e1 + h

    e2 = rbf_gate * e1

    # lane-dense packed output: [e1 | e2] in one (E, 2H) store
    out_ref[...] = jnp.concatenate([e1, e2], axis=-1)


# ------------------------------ wrapper -------------------------------------
_VMEM = pl.BlockSpec(memory_space=pltpu.MemorySpace.VMEM)


def pack_params(p):
    """Fold / concatenate raw per-layer weights into the kernel's slabs."""
    pk = {}
    pk["w_jikj"] = jnp.concatenate([p["wji_t"], p["wkj_t"]], axis=1)   # (H, 2H)
    pk["b_jikj"] = jnp.concatenate([p["bji"], p["bkj"]], axis=1)       # (1, 2H)
    pk["w_rbfcat"] = jnp.concatenate(
        [p["wrbf1_t"] @ p["wrbf2_t"], p["wrbf_t"]], axis=1)            # (R, 2H)
    pk["w_down"] = p["wdown_t"]
    pk["w_sbf1"] = p["wsbf1_t"]
    pk["w_sbf2"] = p["wsbf2_t"]
    pk["w_t1"] = p["wt1_t"]
    pk["w_t2"] = p["wt2_t"]
    pk["w_up"] = p["wup_t"]
    pk["w_lin"] = p["wlin_t"]
    pk["b_lin"] = p["blin"]
    pk["w_res1"] = jnp.concatenate([p["wb1_t"], p["wa1_t"]], axis=0)   # (NR,H,H)
    pk["b_res1"] = jnp.concatenate([p["bb1"], p["ba1"]], axis=0)       # (NR,1,H)
    pk["w_res2"] = jnp.concatenate([p["wb2_t"], p["wa2_t"]], axis=0)
    pk["b_res2"] = jnp.concatenate([p["bb2"], p["ba2"]], axis=0)
    return pk


def update_e_forward(x, emb, idx_kj, idx_ji, params):
    """Mirrors update_e.forward(x, emb, idx_kj, idx_ji) — one fused pallas_call."""
    rbf0, sbf, tor = emb
    x1, _ = x
    e, h = x1.shape

    pk = pack_params(params)
    idx_kj_col = idx_kj.astype(jnp.int32).reshape(-1, 1)   # (T, 1)
    idx_ji_row = idx_ji.astype(jnp.int32).reshape(1, -1)   # (1, T)

    args = (x1, rbf0, sbf, tor, idx_kj_col, idx_ji_row,
            pk["w_jikj"], pk["b_jikj"], pk["w_rbfcat"],
            pk["w_down"], pk["w_sbf1"], pk["w_sbf2"],
            pk["w_t1"], pk["w_t2"], pk["w_up"],
            pk["w_lin"], pk["b_lin"],
            pk["w_res1"], pk["b_res1"], pk["w_res2"], pk["b_res2"])

    out = pl.pallas_call(
        functools.partial(fused_update_e_kernel, num_before=NUM_BEFORE),
        out_shape=jax.ShapeDtypeStruct((e, 2 * h), jnp.float32),
        in_specs=[_VMEM] * len(args),
        out_specs=_VMEM,
    )(*args)

    return out[:, :h], out[:, h:]


# ------------------------------ parameters ----------------------------------
def _w(key, out_dim, in_dim):
    # deterministic stand-in for glorot_orthogonal, stored (out, in) like nn.Linear
    scale = sqrt(2.0 / (in_dim + out_dim))
    return scale * jax.random.normal(key, (out_dim, in_dim), dtype=jnp.float32)


def make_params(key):
    ks = jax.random.split(key, 20)
    sbf_in = NUM_SPH * NUM_RAD
    t_in = NUM_SPH * NUM_SPH * NUM_RAD

    p = {}
    p["wji_t"] = _w(ks[0], HIDDEN, HIDDEN).T
    p["bji"] = jnp.zeros((1, HIDDEN), jnp.float32)
    p["wkj_t"] = _w(ks[1], HIDDEN, HIDDEN).T
    p["bkj"] = jnp.zeros((1, HIDDEN), jnp.float32)
    p["wrbf1_t"] = _w(ks[2], BASIS_DIST, NUM_RAD).T
    p["wrbf2_t"] = _w(ks[3], HIDDEN, BASIS_DIST).T
    p["wdown_t"] = _w(ks[4], INT_EMB, HIDDEN).T
    p["wsbf1_t"] = _w(ks[5], BASIS_ANGLE, sbf_in).T
    p["wsbf2_t"] = _w(ks[6], INT_EMB, BASIS_ANGLE).T
    p["wt1_t"] = _w(ks[7], BASIS_TORSION, t_in).T
    p["wt2_t"] = _w(ks[8], INT_EMB, BASIS_TORSION).T
    p["wup_t"] = _w(ks[9], HIDDEN, INT_EMB).T
    p["wlin_t"] = _w(ks[10], HIDDEN, HIDDEN).T
    p["blin"] = jnp.zeros((1, HIDDEN), jnp.float32)
    p["wrbf_t"] = _w(ks[11], HIDDEN, NUM_RAD).T

    def res_stack(base_key, n):
        kk = jax.random.split(base_key, 2 * max(n, 1))
        w1 = jnp.stack([_w(kk[2 * i], HIDDEN, HIDDEN).T for i in range(n)])
        w2 = jnp.stack([_w(kk[2 * i + 1], HIDDEN, HIDDEN).T for i in range(n)])
        b = jnp.zeros((n, 1, HIDDEN), jnp.float32)
        return w1, b, w2, b

    p["wb1_t"], p["bb1"], p["wb2_t"], p["bb2"] = res_stack(ks[12], NUM_BEFORE)
    p["wa1_t"], p["ba1"], p["wa2_t"], p["ba2"] = res_stack(ks[13], NUM_AFTER)
    return p


# ------------------------------ pure-JAX reference ---------------------------
def reference_forward(x, emb, idx_kj, idx_ji, p):
    rbf0, sbf, t = emb
    x1, _ = x
    x_ji = swish(x1 @ p["wji_t"] + p["bji"])
    x_kj = swish(x1 @ p["wkj_t"] + p["bkj"])
    rbf = rbf0 @ p["wrbf1_t"] @ p["wrbf2_t"]
    x_kj = x_kj * rbf
    x_kj = swish(x_kj @ p["wdown_t"])
    sbf2 = sbf @ p["wsbf1_t"] @ p["wsbf2_t"]
    x_kj = x_kj[idx_kj] * sbf2
    t2 = t @ p["wt1_t"] @ p["wt2_t"]
    x_kj = x_kj * t2
    scat = jax.ops.segment_sum(x_kj, idx_ji, num_segments=x1.shape[0])
    x_kj = swish(scat @ p["wup_t"])
    e1 = x_ji + x_kj
    for l in range(p["wb1_t"].shape[0]):
        h = swish(e1 @ p["wb1_t"][l] + p["bb1"][l])
        h = swish(h @ p["wb2_t"][l] + p["bb2"][l])
        e1 = e1 + h
    e1 = swish(e1 @ p["wlin_t"] + p["blin"]) + x1
    for l in range(p["wa1_t"].shape[0]):
        h = swish(e1 @ p["wa1_t"][l] + p["ba1"][l])
        h = swish(h @ p["wa2_t"][l] + p["ba2"][l])
        e1 = e1 + h
    e2 = (rbf0 @ p["wrbf_t"]) * e1
    return e1, e2


# ------------------------------ main -----------------------------------------
if __name__ == "__main__":
    root = jax.random.PRNGKey(0)
    k_par, k_x1, k_x2, k_rbf, k_sbf, k_t, k_ikj, k_iji = jax.random.split(root, 8)

    params = make_params(k_par)

    x1 = jax.random.normal(k_x1, (E, HIDDEN), dtype=jnp.float32)
    x2 = jax.random.normal(k_x2, (E, HIDDEN), dtype=jnp.float32)   # unused (as in torch)
    rbf0 = jax.random.normal(k_rbf, (E, NUM_RAD), dtype=jnp.float32)
    sbf = jax.random.normal(k_sbf, (T, NUM_SPH * NUM_RAD), dtype=jnp.float32)
    tor = jax.random.normal(k_t, (T, NUM_SPH * NUM_SPH * NUM_RAD), dtype=jnp.float32)
    idx_kj = jax.random.randint(k_ikj, (T,), 0, E, dtype=jnp.int32)
    idx_ji = jax.random.randint(k_iji, (T,), 0, E, dtype=jnp.int32)

    x = (x1, x2)
    emb_tuple = (rbf0, sbf, tor)

    e1, e2 = update_e_forward(x, emb_tuple, idx_kj, idx_ji, params)
    jax.block_until_ready((e1, e2))

    r1, r2 = reference_forward(x, emb_tuple, idx_kj, idx_ji, params)
    assert e1.shape == (E, HIDDEN) and e2.shape == (E, HIDDEN)
    assert jnp.allclose(e1, r1, atol=1e-2, rtol=1e-2)
    assert jnp.allclose(e2, r2, atol=1e-2, rtol=1e-2)

    print("KERNEL_OK")
</pallas_src>

<mosaic_0001>
module attributes {stable_mosaic.version = 11 : i64} {
  func.func @fused_update_e_kernel(%arg0: memref<16x32xf32, #tpu.memory_space<vmem>>, %arg1: memref<16x8xf32, #tpu.memory_space<vmem>>, %arg2: memref<24x32xf32, #tpu.memory_space<vmem>>, %arg3: memref<24x128xf32, #tpu.memory_space<vmem>>, %arg4: memref<24x1xi32, #tpu.memory_space<vmem>>, %arg5: memref<1x24xi32, #tpu.memory_space<vmem>>, %arg6: memref<32x64xf32, #tpu.memory_space<vmem>>, %arg7: memref<1x64xf32, #tpu.memory_space<vmem>>, %arg8: memref<8x64xf32, #tpu.memory_space<vmem>>, %arg9: memref<32x16xf32, #tpu.memory_space<vmem>>, %arg10: memref<32x8xf32, #tpu.memory_space<vmem>>, %arg11: memref<8x16xf32, #tpu.memory_space<vmem>>, %arg12: memref<128x8xf32, #tpu.memory_space<vmem>>, %arg13: memref<8x16xf32, #tpu.memory_space<vmem>>, %arg14: memref<16x32xf32, #tpu.memory_space<vmem>>, %arg15: memref<32x32xf32, #tpu.memory_space<vmem>>, %arg16: memref<1x32xf32, #tpu.memory_space<vmem>>, %arg17: memref<3x32x32xf32, #tpu.memory_space<vmem>>, %arg18: memref<3x1x32xf32, #tpu.memory_space<vmem>>, %arg19: memref<3x32x32xf32, #tpu.memory_space<vmem>>, %arg20: memref<3x1x32xf32, #tpu.memory_space<vmem>>, %arg21: memref<16x64xf32, #tpu.memory_space<vmem>>) attributes {dimension_semantics = [], scalar_prefetch = 0 : i64, scratch_operands = 0 : i64, tpu.core_type = #tpu.core_type<tc>} {
    %c0 = arith.constant 0 : index
    %c0_0 = arith.constant 0 : index
    %0 = vector.load %arg0[%c0, %c0_0] : memref<16x32xf32, #tpu.memory_space<vmem>>, vector<16x32xf32>
    %c0_1 = arith.constant 0 : index
    %c0_2 = arith.constant 0 : index
    %1 = vector.load %arg6[%c0_1, %c0_2] : memref<32x64xf32, #tpu.memory_space<vmem>>, vector<32x64xf32>
    %cst = arith.constant dense<0.000000e+00> : vector<16x64xf32>
    %2 = tpu.matmul %0, %1, %cst {dimension_numbers = #tpu.dot_dimension_numbers<[1], [0], [0], [1], [0, 0, 1, 1], [], []>} : vector<16x32xf32>, vector<32x64xf32>, vector<16x64xf32> -> vector<16x64xf32>
    %c0_3 = arith.constant 0 : index
    %c0_4 = arith.constant 0 : index
    %3 = vector.load %arg7[%c0_3, %c0_4] : memref<1x64xf32, #tpu.memory_space<vmem>>, vector<1x64xf32>
    %4 = vector.broadcast %3 : vector<1x64xf32> to vector<16x64xf32>
    %5 = arith.addf %2, %4 : vector<16x64xf32>
    %6 = arith.negf %5 : vector<16x64xf32>
    %7 = math.exp %6 : vector<16x64xf32>
    %cst_5 = arith.constant 1.000000e+00 : f32
    %8 = vector.broadcast %cst_5 : f32 to vector<16x64xf32>
    %9 = arith.addf %8, %7 : vector<16x64xf32>
    %10 = arith.divf %8, %9 : vector<16x64xf32>
    %11 = arith.mulf %5, %10 : vector<16x64xf32>
    %12 = vector.extract_strided_slice %11 {offsets = [0, 0], sizes = [16, 32], strides = [1, 1]} : vector<16x64xf32> to vector<16x32xf32>
    %13 = vector.extract_strided_slice %11 {offsets = [0, 32], sizes = [16, 32], strides = [1, 1]} : vector<16x64xf32> to vector<16x32xf32>
    %c0_6 = arith.constant 0 : index
    %c0_7 = arith.constant 0 : index
    %14 = vector.load %arg1[%c0_6, %c0_7] : memref<16x8xf32, #tpu.memory_space<vmem>>, vector<16x8xf32>
    %c0_8 = arith.constant 0 : index
    %c0_9 = arith.constant 0 : index
    %15 = vector.load %arg8[%c0_8, %c0_9] : memref<8x64xf32, #tpu.memory_space<vmem>>, vector<8x64xf32>
    %cst_10 = arith.constant dense<0.000000e+00> : vector<16x64xf32>
    %16 = tpu.matmul %14, %15, %cst_10 {dimension_numbers = #tpu.dot_dimension_numbers<[1], [0], [0], [1], [0, 0, 1, 1], [], []>} : vector<16x8xf32>, vector<8x64xf32>, vector<16x64xf32> -> vector<16x64xf32>
    %17 = vector.extract_strided_slice %16 {offsets = [0, 0], sizes = [16, 32], strides = [1, 1]} : vector<16x64xf32> to vector<16x32xf32>
    %18 = vector.extract_strided_slice %16 {offsets = [0, 32], sizes = [16, 32], strides = [1, 1]} : vector<16x64xf32> to vector<16x32xf32>
    %19 = arith.mulf %13, %17 : vector<16x32xf32>
    %c0_11 = arith.constant 0 : index
    %c0_12 = arith.constant 0 : index
    %20 = vector.load %arg9[%c0_11, %c0_12] : memref<32x16xf32, #tpu.memory_space<vmem>>, vector<32x16xf32>
    %cst_13 = arith.constant dense<0.000000e+00> : vector<16x16xf32>
    %21 = tpu.matmul %19, %20, %cst_13 {dimension_numbers = #tpu.dot_dimension_numbers<[1], [0], [0], [1], [0, 0, 1, 1], [], []>} : vector<16x32xf32>, vector<32x16xf32>, vector<16x16xf32> -> vector<16x16xf32>
    %22 = arith.negf %21 : vector<16x16xf32>
    %23 = math.exp %22 : vector<16x16xf32>
    %cst_14 = arith.constant 1.000000e+00 : f32
    %24 = vector.broadcast %cst_14 : f32 to vector<16x16xf32>
    %25 = arith.addf %24, %23 : vector<16x16xf32>
    %26 = arith.divf %24, %25 : vector<16x16xf32>
    %27 = arith.mulf %21, %26 : vector<16x16xf32>
    %c0_15 = arith.constant 0 : index
    %c0_16 = arith.constant 0 : index
    %28 = vector.load %arg2[%c0_15, %c0_16] : memref<24x32xf32, #tpu.memory_space<vmem>>, vector<24x32xf32>
    %c0_17 = arith.constant 0 : index
    %c0_18 = arith.constant 0 : index
    %29 = vector.load %arg10[%c0_17, %c0_18] : memref<32x8xf32, #tpu.memory_space<vmem>>, vector<32x8xf32>
    %cst_19 = arith.constant dense<0.000000e+00> : vector<24x8xf32>
    %30 = tpu.matmul %28, %29, %cst_19 {dimension_numbers = #tpu.dot_dimension_numbers<[1], [0], [0], [1], [0, 0, 1, 1], [], []>} : vector<24x32xf32>, vector<32x8xf32>, vector<24x8xf32> -> vector<24x8xf32>
    %c0_20 = arith.constant 0 : index
    %c0_21 = arith.constant 0 : index
    %31 = vector.load %arg11[%c0_20, %c0_21] : memref<8x16xf32, #tpu.memory_space<vmem>>, vector<8x16xf32>
    %cst_22 = arith.constant dense<0.000000e+00> : vector<24x16xf32>
    %32 = tpu.matmul %30, %31, %cst_22 {dimension_numbers = #tpu.dot_dimension_numbers<[1], [0], [0], [1], [0, 0, 1, 1], [], []>} : vector<24x8xf32>, vector<8x16xf32>, vector<24x16xf32> -> vector<24x16xf32>
    %c0_23 = arith.constant 0 : index
    %c0_24 = arith.constant 0 : index
    %33 = vector.load %arg3[%c0_23, %c0_24] : memref<24x128xf32, #tpu.memory_space<vmem>>, vector<24x128xf32>
    %c0_25 = arith.constant 0 : index
    %c0_26 = arith.constant 0 : index
    %34 = vector.load %arg12[%c0_25, %c0_26] : memref<128x8xf32, #tpu.memory_space<vmem>>, vector<128x8xf32>
    %cst_27 = arith.constant dense<0.000000e+00> : vector<24x8xf32>
    %35 = tpu.matmul %33, %34, %cst_27 {dimension_numbers = #tpu.dot_dimension_numbers<[1], [0], [0], [1], [0, 0, 1, 1], [], []>} : vector<24x128xf32>, vector<128x8xf32>, vector<24x8xf32> -> vector<24x8xf32>
    %c0_28 = arith.constant 0 : index
    %c0_29 = arith.constant 0 : index
    %36 = vector.load %arg13[%c0_28, %c0_29] : memref<8x16xf32, #tpu.memory_space<vmem>>, vector<8x16xf32>
    %cst_30 = arith.constant dense<0.000000e+00> : vector<24x16xf32>
    %37 = tpu.matmul %35, %36, %cst_30 {dimension_numbers = #tpu.dot_dimension_numbers<[1], [0], [0], [1], [0, 0, 1, 1], [], []>} : vector<24x8xf32>, vector<8x16xf32>, vector<24x16xf32> -> vector<24x16xf32>
    %38 = tpu.iota {dimensions = array<i32: 1>} : vector<24x16xi32>
    %c0_31 = arith.constant 0 : index
    %c0_32 = arith.constant 0 : index
    %39 = vector.load %arg4[%c0_31, %c0_32] : memref<24x1xi32, #tpu.memory_space<vmem>>, vector<24x1xi32>
    %40 = vector.broadcast %39 : vector<24x1xi32> to vector<24x16xi32>
    %41 = arith.cmpi eq, %40, %38 : vector<24x16xi32>
    %42 = arith.extui %41 : vector<24x16xi1> to vector<24x16xi32>
    %43 = arith.sitofp %42 : vector<24x16xi32> to vector<24x16xf32>
    %cst_33 = arith.constant dense<0.000000e+00> : vector<24x16xf32>
    %44 = tpu.matmul %43, %27, %cst_33 {dimension_numbers = #tpu.dot_dimension_numbers<[1], [0], [0], [1], [0, 0, 1, 1], [], []>} : vector<24x16xf32>, vector<16x16xf32>, vector<24x16xf32> -> vector<24x16xf32>
    %45 = arith.mulf %44, %32 : vector<24x16xf32>
    %46 = arith.mulf %45, %37 : vector<24x16xf32>
    %47 = tpu.iota {dimensions = array<i32: 0>} : vector<16x24xi32>
    %c0_34 = arith.constant 0 : index
    %c0_35 = arith.constant 0 : index
    %48 = vector.load %arg5[%c0_34, %c0_35] : memref<1x24xi32, #tpu.memory_space<vmem>>, vector<1x24xi32>
    %49 = vector.broadcast %48 : vector<1x24xi32> to vector<16x24xi32>
    %50 = arith.cmpi eq, %47, %49 : vector<16x24xi32>
    %51 = arith.extui %50 : vector<16x24xi1> to vector<16x24xi32>
    %52 = arith.sitofp %51 : vector<16x24xi32> to vector<16x24xf32>
    %cst_36 = arith.constant dense<0.000000e+00> : vector<16x16xf32>
    %53 = tpu.matmul %52, %46, %cst_36 {dimension_numbers = #tpu.dot_dimension_numbers<[1], [0], [0], [1], [0, 0, 1, 1], [], []>} : vector<16x24xf32>, vector<24x16xf32>, vector<16x16xf32> -> vector<16x16xf32>
    %c0_37 = arith.constant 0 : index
    %c0_38 = arith.constant 0 : index
    %54 = vector.load %arg14[%c0_37, %c0_38] : memref<16x32xf32, #tpu.memory_space<vmem>>, vector<16x32xf32>
    %cst_39 = arith.constant dense<0.000000e+00> : vector<16x32xf32>
    %55 = tpu.matmul %53, %54, %cst_39 {dimension_numbers = #tpu.dot_dimension_numbers<[1], [0], [0], [1], [0, 0, 1, 1], [], []>} : vector<16x16xf32>, vector<16x32xf32>, vector<16x32xf32> -> vector<16x32xf32>
    %56 = arith.negf %55 : vector<16x32xf32>
    %57 = math.exp %56 : vector<16x32xf32>
    %cst_40 = arith.constant 1.000000e+00 : f32
    %58 = vector.broadcast %cst_40 : f32 to vector<16x32xf32>
    %59 = arith.addf %58, %57 : vector<16x32xf32>
    %60 = arith.divf %58, %59 : vector<16x32xf32>
    %61 = arith.mulf %55, %60 : vector<16x32xf32>
    %62 = arith.addf %12, %61 : vector<16x32xf32>
    %c0_41 = arith.constant 0 : index
    %c0_42 = arith.constant 0 : index
    %c0_43 = arith.constant 0 : index
    %63 = vector.load %arg17[%c0_41, %c0_42, %c0_43] : memref<3x32x32xf32, #tpu.memory_space<vmem>>, vector<1x32x32xf32>
    %64 = vector.shape_cast %63 : vector<1x32x32xf32> to vector<32x32xf32>
    %cst_44 = arith.constant dense<0.000000e+00> : vector<16x32xf32>
    %65 = tpu.matmul %62, %64, %cst_44 {dimension_numbers = #tpu.dot_dimension_numbers<[1], [0], [0], [1], [0, 0, 1, 1], [], []>} : vector<16x32xf32>, vector<32x32xf32>, vector<16x32xf32> -> vector<16x32xf32>
    %c0_45 = arith.constant 0 : index
    %c0_46 = arith.constant 0 : index
    %c0_47 = arith.constant 0 : index
    %66 = vector.load %arg18[%c0_45, %c0_46, %c0_47] : memref<3x1x32xf32, #tpu.memory_space<vmem>>, vector<1x1x32xf32>
    %67 = vector.shape_cast %66 : vector<1x1x32xf32> to vector<1x32xf32>
    %68 = vector.broadcast %67 : vector<1x32xf32> to vector<16x32xf32>
    %69 = arith.addf %65, %68 : vector<16x32xf32>
    %70 = arith.negf %69 : vector<16x32xf32>
    %71 = math.exp %70 : vector<16x32xf32>
    %cst_48 = arith.constant 1.000000e+00 : f32
    %72 = vector.broadcast %cst_48 : f32 to vector<16x32xf32>
    %73 = arith.addf %72, %71 : vector<16x32xf32>
    %74 = arith.divf %72, %73 : vector<16x32xf32>
    %75 = arith.mulf %69, %74 : vector<16x32xf32>
    %c0_49 = arith.constant 0 : index
    %c0_50 = arith.constant 0 : index
    %c0_51 = arith.constant 0 : index
    %76 = vector.load %arg19[%c0_49, %c0_50, %c0_51] : memref<3x32x32xf32, #tpu.memory_space<vmem>>, vector<1x32x32xf32>
    %77 = vector.shape_cast %76 : vector<1x32x32xf32> to vector<32x32xf32>
    %cst_52 = arith.constant dense<0.000000e+00> : vector<16x32xf32>
    %78 = tpu.matmul %75, %77, %cst_52 {dimension_numbers = #tpu.dot_dimension_numbers<[1], [0], [0], [1], [0, 0, 1, 1], [], []>} : vector<16x32xf32>, vector<32x32xf32>, vector<16x32xf32> -> vector<16x32xf32>
    %c0_53 = arith.constant 0 : index
    %c0_54 = arith.constant 0 : index
    %c0_55 = arith.constant 0 : index
    %79 = vector.load %arg20[%c0_53, %c0_54, %c0_55] : memref<3x1x32xf32, #tpu.memory_space<vmem>>, vector<1x1x32xf32>
    %80 = vector.shape_cast %79 : vector<1x1x32xf32> to vector<1x32xf32>
    %81 = vector.broadcast %80 : vector<1x32xf32> to vector<16x32xf32>
    %82 = arith.addf %78, %81 : vector<16x32xf32>
    %83 = arith.negf %82 : vector<16x32xf32>
    %84 = math.exp %83 : vector<16x32xf32>
    %cst_56 = arith.constant 1.000000e+00 : f32
    %85 = vector.broadcast %cst_56 : f32 to vector<16x32xf32>
    %86 = arith.addf %85, %84 : vector<16x32xf32>
    %87 = arith.divf %85, %86 : vector<16x32xf32>
    %88 = arith.mulf %82, %87 : vector<16x32xf32>
    %89 = arith.addf %62, %88 : vector<16x32xf32>
    %c0_57 = arith.constant 0 : index
    %c0_58 = arith.constant 0 : index
    %90 = vector.load %arg15[%c0_57, %c0_58] : memref<32x32xf32, #tpu.memory_space<vmem>>, vector<32x32xf32>
    %cst_59 = arith.constant dense<0.000000e+00> : vector<16x32xf32>
    %91 = tpu.matmul %89, %90, %cst_59 {dimension_numbers = #tpu.dot_dimension_numbers<[1], [0], [0], [1], [0, 0, 1, 1], [], []>} : vector<16x32xf32>, vector<32x32xf32>, vector<16x32xf32> -> vector<16x32xf32>
    %c0_60 = arith.constant 0 : index
    %c0_61 = arith.constant 0 : index
    %92 = vector.load %arg16[%c0_60, %c0_61] : memref<1x32xf32, #tpu.memory_space<vmem>>, vector<1x32xf32>
    %93 = vector.broadcast %92 : vector<1x32xf32> to vector<16x32xf32>
    %94 = arith.addf %91, %93 : vector<16x32xf32>
    %95 = arith.negf %94 : vector<16x32xf32>
    %96 = math.exp %95 : vector<16x32xf32>
    %cst_62 = arith.constant 1.000000e+00 : f32
    %97 = vector.broadcast %cst_62 : f32 to vector<16x32xf32>
    %98 = arith.addf %97, %96 : vector<16x32xf32>
    %99 = arith.divf %97, %98 : vector<16x32xf32>
    %100 = arith.mulf %94, %99 : vector<16x32xf32>
    %101 = arith.addf %100, %0 : vector<16x32xf32>
    %c1 = arith.constant 1 : index
    %c0_63 = arith.constant 0 : index
    %c0_64 = arith.constant 0 : index
    %102 = vector.load %arg17[%c1, %c0_63, %c0_64] : memref<3x32x32xf32, #tpu.memory_space<vmem>>, vector<1x32x32xf32>
    %103 = vector.shape_cast %102 : vector<1x32x32xf32> to vector<32x32xf32>
    %cst_65 = arith.constant dense<0.000000e+00> : vector<16x32xf32>
    %104 = tpu.matmul %101, %103, %cst_65 {dimension_numbers = #tpu.dot_dimension_numbers<[1], [0], [0], [1], [0, 0, 1, 1], [], []>} : vector<16x32xf32>, vector<32x32xf32>, vector<16x32xf32> -> vector<16x32xf32>
    %c1_66 = arith.constant 1 : index
    %c0_67 = arith.constant 0 : index
    %c0_68 = arith.constant 0 : index
    %105 = vector.load %arg18[%c1_66, %c0_67, %c0_68] : memref<3x1x32xf32, #tpu.memory_space<vmem>>, vector<1x1x32xf32>
    %106 = vector.shape_cast %105 : vector<1x1x32xf32> to vector<1x32xf32>
    %107 = vector.broadcast %106 : vector<1x32xf32> to vector<16x32xf32>
    %108 = arith.addf %104, %107 : vector<16x32xf32>
    %109 = arith.negf %108 : vector<16x32xf32>
    %110 = math.exp %109 : vector<16x32xf32>
    %cst_69 = arith.constant 1.000000e+00 : f32
    %111 = vector.broadcast %cst_69 : f32 to vector<16x32xf32>
    %112 = arith.addf %111, %110 : vector<16x32xf32>
    %113 = arith.divf %111, %112 : vector<16x32xf32>
    %114 = arith.mulf %108, %113 : vector<16x32xf32>
    %c1_70 = arith.constant 1 : index
    %c0_71 = arith.constant 0 : index
    %c0_72 = arith.constant 0 : index
    %115 = vector.load %arg19[%c1_70, %c0_71, %c0_72] : memref<3x32x32xf32, #tpu.memory_space<vmem>>, vector<1x32x32xf32>
    %116 = vector.shape_cast %115 : vector<1x32x32xf32> to vector<32x32xf32>
    %cst_73 = arith.constant dense<0.000000e+00> : vector<16x32xf32>
    %117 = tpu.matmul %114, %116, %cst_73 {dimension_numbers = #tpu.dot_dimension_numbers<[1], [0], [0], [1], [0, 0, 1, 1], [], []>} : vector<16x32xf32>, vector<32x32xf32>, vector<16x32xf32> -> vector<16x32xf32>
    %c1_74 = arith.constant 1 : index
    %c0_75 = arith.constant 0 : index
    %c0_76 = arith.constant 0 : index
    %118 = vector.load %arg20[%c1_74, %c0_75, %c0_76] : memref<3x1x32xf32, #tpu.memory_space<vmem>>, vector<1x1x32xf32>
    %119 = vector.shape_cast %118 : vector<1x1x32xf32> to vector<1x32xf32>
    %120 = vector.broadcast %119 : vector<1x32xf32> to vector<16x32xf32>
    %121 = arith.addf %117, %120 : vector<16x32xf32>
    %122 = arith.negf %121 : vector<16x32xf32>
    %123 = math.exp %122 : vector<16x32xf32>
    %cst_77 = arith.constant 1.000000e+00 : f32
    %124 = vector.broadcast %cst_77 : f32 to vector<16x32xf32>
    %125 = arith.addf %124, %123 : vector<16x32xf32>
    %126 = arith.divf %124, %125 : vector<16x32xf32>
    %127 = arith.mulf %121, %126 : vector<16x32xf32>
    %128 = arith.addf %101, %127 : vector<16x32xf32>
    %c2 = arith.constant 2 : index
    %c0_78 = arith.constant 0 : index
    %c0_79 = arith.constant 0 : index
    %129 = vector.load %arg17[%c2, %c0_78, %c0_79] : memref<3x32x32xf32, #tpu.memory_space<vmem>>, vector<1x32x32xf32>
    %130 = vector.shape_cast %129 : vector<1x32x32xf32> to vector<32x32xf32>
    %cst_80 = arith.constant dense<0.000000e+00> : vector<16x32xf32>
    %131 = tpu.matmul %128, %130, %cst_80 {dimension_numbers = #tpu.dot_dimension_numbers<[1], [0], [0], [1], [0, 0, 1, 1], [], []>} : vector<16x32xf32>, vector<32x32xf32>, vector<16x32xf32> -> vector<16x32xf32>
    %c2_81 = arith.constant 2 : index
    %c0_82 = arith.constant 0 : index
    %c0_83 = arith.constant 0 : index
    %132 = vector.load %arg18[%c2_81, %c0_82, %c0_83] : memref<3x1x32xf32, #tpu.memory_space<vmem>>, vector<1x1x32xf32>
    %133 = vector.shape_cast %132 : vector<1x1x32xf32> to vector<1x32xf32>
    %134 = vector.broadcast %133 : vector<1x32xf32> to vector<16x32xf32>
    %135 = arith.addf %131, %134 : vector<16x32xf32>
    %136 = arith.negf %135 : vector<16x32xf32>
    %137 = math.exp %136 : vector<16x32xf32>
    %cst_84 = arith.constant 1.000000e+00 : f32
    %138 = vector.broadcast %cst_84 : f32 to vector<16x32xf32>
    %139 = arith.addf %138, %137 : vector<16x32xf32>
    %140 = arith.divf %138, %139 : vector<16x32xf32>
    %141 = arith.mulf %135, %140 : vector<16x32xf32>
    %c2_85 = arith.constant 2 : index
    %c0_86 = arith.constant 0 : index
    %c0_87 = arith.constant 0 : index
    %142 = vector.load %arg19[%c2_85, %c0_86, %c0_87] : memref<3x32x32xf32, #tpu.memory_space<vmem>>, vector<1x32x32xf32>
    %143 = vector.shape_cast %142 : vector<1x32x32xf32> to vector<32x32xf32>
    %cst_88 = arith.constant dense<0.000000e+00> : vector<16x32xf32>
    %144 = tpu.matmul %141, %143, %cst_88 {dimension_numbers = #tpu.dot_dimension_numbers<[1], [0], [0], [1], [0, 0, 1, 1], [], []>} : vector<16x32xf32>, vector<32x32xf32>, vector<16x32xf32> -> vector<16x32xf32>
    %c2_89 = arith.constant 2 : index
    %c0_90 = arith.constant 0 : index
    %c0_91 = arith.constant 0 : index
    %145 = vector.load %arg20[%c2_89, %c0_90, %c0_91] : memref<3x1x32xf32, #tpu.memory_space<vmem>>, vector<1x1x32xf32>
    %146 = vector.shape_cast %145 : vector<1x1x32xf32> to vector<1x32xf32>
    %147 = vector.broadcast %146 : vector<1x32xf32> to vector<16x32xf32>
    %148 = arith.addf %144, %147 : vector<16x32xf32>
    %149 = arith.negf %148 : vector<16x32xf32>
    %150 = math.exp %149 : vector<16x32xf32>
    %cst_92 = arith.constant 1.000000e+00 : f32
    %151 = vector.broadcast %cst_92 : f32 to vector<16x32xf32>
    %152 = arith.addf %151, %150 : vector<16x32xf32>
    %153 = arith.divf %151, %152 : vector<16x32xf32>
    %154 = arith.mulf %148, %153 : vector<16x32xf32>
    %155 = arith.addf %128, %154 : vector<16x32xf32>
    %156 = arith.mulf %18, %155 : vector<16x32xf32>
    %157 = tpu.concatenate %155, %156 in 1 : vector<16x32xf32>, vector<16x32xf32> -> vector<16x64xf32>
    %c0_93 = arith.constant 0 : index
    %c0_94 = arith.constant 0 : index
    %158 = vector.load %arg21[%c0_93, %c0_94] : memref<16x64xf32, #tpu.memory_space<vmem>>, vector<16x64xf32>
    tpu.vector_store %arg21[%c0_93, %c0_94], %157 {strides = array<i32>} : memref<16x64xf32, #tpu.memory_space<vmem>>, vector<16x64xf32>,
    return
  }
}

</mosaic_0001>

<bundles_post_ra>
// kernel: tpu_custom_call.1
= control target key start
LH: loop header
LB: loop body
LE: loop exit
PB: predicated region body
PF: predicated region fallthrough
CT: control target
= control target key end

     0   :  { %s2039_s0 = inlined_call_operand.vmem [shape: f32[16,32], index: 0, kind: input, shape index: {}]   ;;  %s2040_s1 = inlined_call_operand.vmem [shape: f32[16,8], index: 1, kind: input, shape index: {}]   ;;  %s2041_s2 = inlined_call_operand.vmem [shape: f32[24,32], index: 2, kind: input, shape index: {}]   ;;  %s2042_s3 = inlined_call_operand.vmem [shape: f32[24,128], index: 3, kind: input, shape index: {}]   ;;  %s2043_s4 = inlined_call_operand.vmem [shape: s32[24,1], index: 4, kind: input, shape index: {}]   ;;  %s2044_s5 = inlined_call_operand.hbm [shape: s32[1,24], index: 5, kind: input, shape index: {}]   ;;  %s2045_s6 = inlined_call_operand.vmem [shape: f32[32,64], index: 6, kind: input, shape index: {}]   ;;  %s2046_s7 = inlined_call_operand.hbm [shape: f32[1,64], index: 7, kind: input, shape index: {}]   ;;  %s2047_s8 = inlined_call_operand.hbm [shape: f32[8,64], index: 8, kind: input, shape index: {}]   ;;  %s2048_s9 = inlined_call_operand.vmem [shape: f32[32,16], index: 9, kind: input, shape index: {}]   ;;  %s2049_s10 = inlined_call_operand.vmem [shape: f32[32,8], index: 10, kind: input, shape index: {}]   ;;  %s2050_s11 = inlined_call_operand.vmem [shape: f32[8,16], index: 11, kind: input, shape index: {}]   ;;  %s2051_s12 = inlined_call_operand.vmem [shape: f32[128,8], index: 12, kind: input, shape index: {}]   ;;  %s2052_s13 = inlined_call_operand.hbm [shape: f32[8,16], index: 13, kind: input, shape index: {}]   ;;  %s2053_s14 = inlined_call_operand.vmem [shape: f32[16,32], index: 14, kind: input, shape index: {}]   ;;  %s2054_s15 = inlined_call_operand.vmem [shape: f32[32,32], index: 15, kind: input, shape index: {}]   ;;  %s2055_s16 = inlined_call_operand.vmem [shape: f32[1,32], index: 16, kind: input, shape index: {}]   ;;  %s2056_s17 = inlined_call_operand.vmem [shape: f32[3,32,32], index: 17, kind: input, shape index: {}]   ;;  %s2057_s18 = inlined_call_operand.vmem [shape: f32[3,1,32], index: 18, kind: input, shape index: {}]   ;;  %s2058_s19 = inlined_call_operand.hbm [shape: f32[3,32,32], index: 19, kind: input, shape index: {}]   ;;  %s2059_s20 = inlined_call_operand.vmem [shape: f32[3,1,32], index: 20, kind: input, shape index: {}]   ;;  %s2060_s21 = inlined_call_operand.hbm [shape: f32[16,64], index: 21, kind: output, shape index: {}]  }
   0x1   :  { %2066 = sst [smem:[#allocation16_spill]] %s2039_s0 }
   0x2   :  { %2067 = sst [smem:[#allocation17_spill]] %s2040_s1 }
   0x3   :  { %2068 = sst [smem:[#allocation18_spill]] %s2041_s2 }
   0x4   :  { %2069 = sst [smem:[#allocation19_spill]] %s2042_s3 }
   0x5   :  { %2070 = sst [smem:[#allocation20_spill]] %s2043_s4 }
   0x6   :  { %2071 = sst [smem:[#allocation21_spill]] %s2044_s5 }
   0x7   :  { %26 = vsyncpa [#allocation3], 0 }
   0x8   :  { %27 = vsyncpa [#allocation6], 0 }
   0x9   :  { %28 = vsyncpa [#allocation9], 0  ;;  %s58_s26 = sshll.u32 %s2046_s7, 4  ;;  %s59_s26 = int_to_ptr.hbm [resolvable:$true] %s58_s26 }
   0xa   :  { %29 = vsyncpa [#allocation4], 0  ;;  %s1600_s27 = smov [#allocation5]   ;;  %s88_s0 = sshll.u32 %s2052_s13, 4  ;;  %s89_s0 = int_to_ptr.hbm [resolvable:$true] %s88_s0 }
   0xb   :  { %s60_s3 = sshll.u32 %s1600_s27, 4  ;;  %s1601_s4 = smov [#allocation8]   ;;  %s61_s3 = int_to_ptr.vmem [resolvable:$true] %s60_s3 }
   0xc   :  { %63 = dma.hbm_to_vmem [thread:$0]  %s59_s26, 16, %s61_s3, [#allocation6]  }
   0xd   :  { %s90_s30 = sshll.u32 %s1601_s4, 4  ;;  %s2072_s23 = sld [smem:[#allocation21_spill]]  ;;  %s91_s30 = int_to_ptr.vmem [resolvable:$true] %s90_s30 }
   0xe   :  { %93 = dma.hbm_to_vmem [thread:$0]  %s89_s0, 128, %s91_s30, [#allocation9]  }
   0xf   :  { %s69_s2 = sshll.u32 %s2047_s8, 4  ;;  %s1602_s25 = smov [#allocation2]   ;;  %s70_s2 = int_to_ptr.hbm [resolvable:$true] %s69_s2 }
  0x10   :  { %s47_s27 = sshll.u32 %s1602_s25, 4  ;;  %s1603_s13 = smov [#allocation7]   ;;  %s48_s27 = int_to_ptr.vmem [resolvable:$true] %s47_s27 }
  0x11   :  { %s71_s26 = sshll.u32 %s1603_s13, 4  ;;  %s108_s29 = sshll.u32 %s2058_s19, 4  ;;  %s72_s26 = int_to_ptr.vmem [resolvable:$true] %s71_s26  ;;  %s109_s29 = int_to_ptr.hbm [resolvable:$true] %s108_s29 }
  0x12   :  { %74 = dma.hbm_to_vmem [thread:$0]  %s70_s2, 128, %s72_s26, [#allocation6]  }
  0x13   :  { %s45_s1 = sshll.u32 %s2072_s23, 4  ;;  %s1604_s4 = smov [#allocation10]   ;;  %s46_s1 = int_to_ptr.hbm [resolvable:$true] %s45_s1 }
  0x14   :  { %50 = dma.hbm_to_vmem [thread:$0]  %s46_s1, 16, %s48_s27, [#allocation3]  }
  0x15   :  { %s110_s0 = sshll.u32 %s1604_s4, 4  ;;  %s1605_s30 = smov 128   ;;  %s111_s0 = int_to_ptr.vmem [resolvable:$true] %s110_s0 }
  0x16   :  { %s1606_s5 = smov 8  }
  0x17   :  { %116 = dma.hbm_to_vmem [thread:$0]  %s109_s29, 1536, %s111_s0, [#allocation9], %s1605_s30, %s1605_s30, %s1606_s5  }
  0x18   :  { %1592 = dma.done.wait [#allocation3], 16  }
  0x19   :  { %1593 = vsyncadd [#allocation3], 4294967280 }
  0x1a   :  { %1594 = dma.done.wait [#allocation6], 144  }
  0x1b   :  { %1595 = vsyncadd [#allocation6], 4294967152 }
  0x1c   :  { %1596 = dma.done.wait [#allocation9], 1664  }
  0x1d   :  { %1597 = vsyncadd [#allocation9], 4294965632  ;;  %vm222_vm0 = vcmask 64512   ;;  %v221_v0 = vld [vmem:[#allocation7] sm:$0xff]  ;;  %s2073_s22 = sld [smem:[#allocation17_spill]]  ;;  %v144_v2 = vld [vmem:[%s2045_s6 + $0x18] sm:$0xff] }
  0x1e   :  { %244 = vmatpush.msra.mxu1 %v221_v0  ;;  %v143_v3 = vld [vmem:[%s2045_s6 + $0x10] sm:$0xff]  ;;  %168 = vmatpush.msra.mxu0 %v144_v2  ;;  %v142_v4 = vld [vmem:[%s2045_s6 + $0x8] sm:$0xff]  ;;  %v141_v5 = vld [vmem:[%s2045_s6] sm:$0xff]  ;;  %s2074_s28 = sld [smem:[#allocation16_spill]]  ;;  %vm149_vm1 = vcmask 261120   ;;  %s1607_s8 = smov 32  }
  0x1f   :  { %v1359_v12 = vld [vmem:[#allocation5] ss:$0 sm:$0xff]  ;;  %v265_v24 = vld [vmem:[%s2048_s9 + $0x18] sm:$0xff]  ;;  %v264_v25 = vld [vmem:[%s2048_s9 + $0x10] sm:$0xff]  ;;  %s2076_s25 = sld [smem:[#allocation20_spill]]  ;;  %s1253_s19 = sshll.u32 %s2060_s21, 4  ;;  %s1254_s19 = int_to_ptr.hbm [resolvable:$true] %s1253_s19 }
  0x20   :  { %169 = vmatpush.msra.mxu0 %v143_v3  ;;  %288 = vmatpush.msra.mxu2 %v265_v24  ;;  %v263_v27 = vld [vmem:[%s2048_s9 + $0x8] sm:$0xff]  ;;  %v262_v29 = vld [vmem:[%s2048_s9] sm:$0xff]  ;;  %s1608_s9 = smov 96   ;;  %v435_v52 = vld [vmem:[%s2051_s12 + $0x78] sm:$0xff]  ;;  %s2077_s13 = sld [smem:[#allocation19_spill]] }
  0x21   :  { %v434_v53 = vld [vmem:[%s2051_s12 + $0x70] sm:$0xff]  ;;  %v433_v54 = vld [vmem:[%s2051_s12 + $0x68] sm:$0xff]  ;;  %v345_v55 = vld [vmem:[%s2049_s10 + $0x18] sm:$0xff] }
  0x22   :  { %170 = vmatpush.msra.mxu0 %v142_v4  ;;  %289 = vmatpush.msra.mxu2 %v264_v25  ;;  %v432_v56 = vld [vmem:[%s2051_s12 + $0x60] sm:$0xff]  ;;  %v344_v57 = vld [vmem:[%s2049_s10 + $0x10] sm:$0xff]  ;;  %v343_v58 = vld [vmem:[%s2049_s10 + $0x8] sm:$0xff] }
  0x23   :  { %v219_v1 = vld [vmem:[%s2073_s22] sm:$0xff]  ;;  %v220_v7 = vld [vmem:[%s2073_s22 + $0x8] sm:$0xff]  ;;  %367 = vmatpush.msra.mxu3 %v345_v55  ;;  %v431_v59 = vld [vmem:[%s2051_s12 + $0x58] sm:$0xff] }
  0x24   :  { %1272 = vmatmul.msk.f32.vlgmr.msra.gmra.mxu1 %vm222_vm0, %v219_v1  ;;  %v1759_v6 = vld [vmem:[%s2074_s28] sm:$0xff]  ;;  %171 = vmatpush.msra.mxu0 %v141_v5  ;;  %v1770_v8 = vld [vmem:[%s2074_s28 + $0x8] sm:$0xff]  ;;  %v430_v61 = vld [vmem:[%s2051_s12 + $0x50] sm:$0xff]  ;;  %s2075_s28 = sld [smem:[#allocation18_spill]]  ;;  %v1609_v5 = vmov 0  }
  0x25   :  { %1268 = vmatmul.msk.f32.vlgmr.msra.gmra.mxu0 %vm149_vm1, %v1759_v6  ;;  %290 = vmatpush.msra.mxu2 %v263_v27  ;;  %v342_v60 = vld [vmem:[%s2049_s10] sm:$0xff]  ;;  %v429_v63 = vld [vmem:[%s2051_s12 + $0x48] sm:$0xff]  ;;  %v427_v1 = vld [vmem:[%s2051_s12 + $0x38] sm:$0xff] }
  0x26   :  { %436 = vmatpush.msrb.mxu0 %v435_v52  ;;  %368 = vmatpush.msra.mxu3 %v344_v57  ;;  %v428_v0 = vld [vmem:[%s2051_s12 + $0x40] sm:$0xff]  ;;  %v426_v2 = vld [vmem:[%s2051_s12 + $0x30] sm:$0xff] }
  0x27   :  { %291 = vmatpush.msra.mxu2 %v262_v29  ;;  %v502_v4 = vld [vmem:[%s2076_s25 + $0x10] sm:$0xff]  ;;  %1358 = vset.pattern.permute.xlu0 %v1609_v5 }
  0x28   :  { %437 = vmatpush.msrb.mxu0 %v434_v53  ;;  %369 = vmatpush.msra.mxu3 %v343_v58 }
  0x29   :  { %1357 = vset.pattern.permute.xlu2 %v1609_v5 }
  0x2a   :  { %438 = vmatpush.msrb.mxu0 %v433_v54  ;;  %v339_v62 = vld [vmem:[%s2075_s28] sm:$0xff]  ;;  %370 = vmatpush.msra.mxu3 %v342_v60  ;;  %v340_v3 = vld [vmem:[%s2075_s28 + $0x8] sm:$0xff] }
  0x2b   :  { %1278 = vmatmul.msk.f32.vlgmr.msra.gmra.mxu3 %vm149_vm1, %v339_v62 }
  0x2c   :  { %1273 = vmatmul.msk.f32.gmra.mxu1 %vm222_vm0, %v220_v7  ;;  %439 = vmatpush.msrb.mxu0 %v432_v56  ;;  %v500_v7 = vld [vmem:[%s2076_s25] sm:$0xff] }
  0x2d   :  { %1269 = vmatmul.msk.f32.gmra.mxu0 %vm149_vm1, %v1770_v8  ;;  %504 = vperm.xlu2 %1357, %v500_v7  }
  0x2e   :  { %440 = vmatpush.msrb.mxu0 %v431_v59 }
  0x30   :  { %441 = vmatpush.msrb.mxu0 %v430_v61 }
  0x32   :  { %442 = vmatpush.msrb.mxu0 %v429_v63 }
  0x33   :  { %1279 = vmatmul.msk.f32.gmra.mxu3 %vm149_vm1, %v340_v3 }
  0x34   :  { %443 = vmatpush.msrb.mxu0 %v428_v0 }
  0x36   :  { %444 = vmatpush.msrb.mxu0 %v427_v1 }
  0x38   :  { %445 = vmatpush.msrb.mxu0 %v426_v2  ;;  %v1610_v2 = vmov 0.0  }
  0x87   :  { %v505_v57 = vpop.permute.xlu2 %504 }
  0xa1   :  { %v1774_v9 = vpop.f32.mrf.mxu1 }
  0xa2   :  { %254 = vrot.lane.b32.xlu0 %v1774_v9, %s1607_s8  ;;  %v173_v11 = vpop.f32.mrf.mxu0 }
  0xa3   :  { %v174_v13 = vadd.f32 %v1359_v12, %v173_v11  ;;  %v425_v11 = vld [vmem:[%s2051_s12 + $0x28] sm:$0xff] }
  0xa4   :  { %446 = vmatpush.msrb.mxu0 %v425_v11 }
  0xa5   :  { %v1270_v14 = vmul.f32 -1.442695, %v174_v13 }
  0xa7   :  { %1368 = vpow2.f32 %v1270_v14 }
  0xa9   :  { %v1778_v10 = vpop.f32.mrf.mxu1 }
  0xaa   :  { %256 = vrot.lane.b32.xlu0 %v1778_v10, %s1607_s8  ;;  %v176_v15 = vpop.f32.mrf.mxu0 }
  0xab   :  { %v177_v16 = vadd.f32 %v1359_v12, %v176_v15  ;;  %v424_v12 = vld [vmem:[%s2051_s12 + $0x20] sm:$0xff]  ;;  %v422_v15 = vld [vmem:[%s2051_s12 + $0x10] sm:$0xff] }
  0xac   :  { %447 = vmatpush.msrb.mxu0 %v424_v12 }
  0xad   :  { %v1271_v17 = vmul.f32 -1.442695, %v177_v16  ;;  %v1369_v18 = vpop.eup %1368 }
  0xae   :  { %v185_v19 = vadd.f32 1.0, %v1369_v18  ;;  %v421_v18 = vld [vmem:[%s2051_s12 + $0x8] sm:$0xff] }
  0xaf   :  { %1370 = vpow2.f32 %v1271_v17  ;;  %v501_v17 = vld [vmem:[%s2076_s25 + $0x8] sm:$0xff] }
  0xb0   :  { %1372 = vrcp.f32 %v185_v19  ;;  %vm192_vm2 = vweird.f32 %v185_v19  ;;  %v198_v32 = vand.u32 2147483648, %v185_v19  ;;  %v196_v34 = vand.u32 2147483647, %v185_v19  ;;  %507 = vperm.xlu2 %1357, %v501_v17  }
  0xb2   :  { %v199_v36 = vor.u32 1.1754944e-38, %v198_v32  ;;  %vm197_vm5 = vcmp.eq.f32.partialorder %v196_v34, 8.507059e+37  ;;  %510 = vperm.xlu0 %1358, %v502_v4   ;;  %v372_v32 = vpop.f32.mrf.mxu3 }
  0xb5   :  { %v1371_v20 = vpop.eup %1370 }
  0xb6   :  { %v186_v21 = vadd.f32 1.0, %v1371_v20  ;;  %v1373_v22 = vpop.eup %1372  ;;  %v417_v20 = vld [vmem:[%s2077_s13] sm:$0xff] }
  0xb7   :  { %v188_v23 = vmul.f32 %v1373_v22, %v185_v19  ;;  %vm193_vm3 = vweird.f32 %v1373_v22  ;;  %v420_v19 = vld [vmem:[%s2051_s12] sm:$0xff] }
  0xb8   :  { %1374 = vrcp.f32 %v186_v21  ;;  %vm194_vm4 = vmor %vm192_vm2, %vm193_vm3  ;;  %vm207_vm6 = vweird.f32 %v186_v21  ;;  %v213_v40 = vand.u32 2147483648, %v186_v21  ;;  %v211_v42 = vand.u32 2147483647, %v186_v21 }
  0xb9   :  { %v189_v26 = vsub.f32 1.0, %v188_v23  ;;  %v419_v23 = vld [vmem:[%s2077_s13 + $0x10] sm:$0xff] }
  0xba   :  { %v214_v45 = vor.u32 1.1754944e-38, %v213_v40  ;;  %vm212_vm9 = vcmp.eq.f32.partialorder %v211_v42, 8.507059e+37 }
  0xbb   :  { %v190_v30 = vmul.f32 %v1373_v22, %v189_v26 }
  0xbd   :  { %v191_v33 = vadd.f32 %v1373_v22, %v190_v30 }
  0xbe   :  { %v1375_v28 = vpop.eup %1374 }
  0xbf   :  { %v203_v31 = vmul.f32 %v1375_v28, %v186_v21  ;;  %v195_v37 = vsel %vm194_vm4, %v1373_v22, %v191_v33  ;;  %vm208_vm7 = vweird.f32 %v1375_v28  ;;  %v418_v22 = vld [vmem:[%s2077_s13 + $0x8] sm:$0xff]  ;;  %v381_v33 = vld [vmem:[%s2050_s11] sm:$0xff]  ;;  %vm521_vm4 = vcmask 130048  }
  0xc0   :  { %v200_v39 = vsel %vm197_vm5, %v199_v36, %v195_v37  ;;  %vm209_vm8 = vmor %vm207_vm6, %vm208_vm7  ;;  %406 = vmatpush.msrb.mxu1 %v381_v33 }
  0xc1   :  { %v204_v35 = vsub.f32 1.0, %v203_v31  ;;  %v1794_v43 = vmul.f32 %v200_v39, %v174_v13  ;;  %v423_v13 = vld [vmem:[%s2051_s12 + $0x18] sm:$0xff]  ;;  %v462_v31 = vld [vmem:[#allocation8] sm:$0xff]  ;;  %1281 = vmatmul.msk.f32.vlgmr.msrb.gmra.mxu1 %vm222_vm0, %v372_v32 }
  0xc2   :  { %448 = vmatpush.msrb.mxu0 %v423_v13  ;;  %487 = vmatpush.msrb.mxu2 %v462_v31 }
  0xc3   :  { %v205_v38 = vmul.f32 %v1375_v28, %v204_v35 }
  0xc4   :  { %449 = vmatpush.msrb.mxu0 %v422_v15 }
  0xc5   :  { %v206_v41 = vadd.f32 %v1375_v28, %v205_v38  ;;  %v375_v38 = vpop.f32.mrf.mxu3 }
  0xc6   :  { %450 = vmatpush.msrb.mxu0 %v421_v18 }
  0xc7   :  { %v210_v47 = vsel %vm209_vm8, %v1375_v28, %v206_v41  ;;  %vm574_vm8 = vcmask 195584  }
  0xc8   :  { %v215_v48 = vsel %vm212_vm9, %v214_v45, %v210_v47  ;;  %451 = vmatpush.msrb.mxu0 %v420_v19  ;;  %v498_v47 = vlaneseq }
  0xc9   :  { %v1797_v49 = vmul.f32 %v215_v48, %v177_v16  ;;  %v341_v16 = vld [vmem:[%s2075_s28 + $0x10] sm:$0xff]  ;;  %452 = vmatmul.f32.vlgmr.msrb.gmra.mxu0 %v417_v20  ;;  %1282 = vmatmul.msk.f32.gmra.mxu1 %vm222_vm0, %v375_v38 }
  0xca   :  { %1280 = vmatmul.msk.f32.gmra.mxu3 %vm149_vm1, %v341_v16  ;;  %v499_v56 = vand.u32 127, %v498_v47  ;;  %v605_v16 = vld [vmem:[%s2053_s14 + $0x8] sm:$0xff]  ;;  %v679_v38 = vld [vmem:[%s2056_s17 + $0x10] sm:$0xff] }
  0xcc   :  { %vm512_vm3 = vcmp.eq.s32.totalorder %v505_v57, %v499_v56 }
  0xcd   :  { %v1287_v3 = vsel %vm512_vm3, 1.0, %v1610_v2 }
  0xd1   :  { %455 = vmatmul.f32.gmra.mxu0 %v418_v22 }
  0xd9   :  { %458 = vmatmul.f32.gmra.mxu0 %v419_v23  ;;  %v564_v23 = vshrl.u32 %v498_v47, 7 }
  0xdb   :  { %v565_v32 = vadd.s32 8, %v564_v23 }
 0x10a   :  { %v508_v5 = vpop.permute.xlu2 %507 }
 0x10b   :  { %vm513_vm5 = vcmp.eq.s32.totalorder %v508_v5, %v499_v56 }
 0x10c   :  { %v1288_v7 = vsel %vm513_vm5, 1.0, %v1610_v2 }
 0x114   :  { %v255_v44 = vpop.permute.xlu0 %254 }
 0x115   :  { %v260_v46 = vmul.f32 %v255_v44, %v1794_v43 }
 0x117   :  { %268 = vrot.lane.b32.xlu1 %v260_v46, %s1608_s9 }
 0x11c   :  { %v257_v50 = vpop.permute.xlu0 %256 }
 0x11d   :  { %v261_v51 = vmul.f32 %v257_v50, %v1797_v49 }
 0x11f   :  { %270 = vrot.lane.b32.xlu1 %v261_v51, %s1608_s9 }
 0x124   :  { %v511_v11 = vpop.permute.xlu0 %510 }
 0x125   :  { %vm514_vm6 = vcmp.eq.s32.totalorder %v511_v11, %v499_v56 }
 0x126   :  { %v1289_v12 = vsel %vm514_vm6, 1.0, %v1610_v2 }
 0x13e   :  { %v408_v13 = vpop.f32.mrf.mxu1 }
 0x146   :  { %v453_v30 = vpop.f32.mrf.mxu0  ;;  %v411_v17 = vpop.f32.mrf.mxu1 }
 0x14d   :  { %v378_v45 = vpop.f32.mrf.mxu3 }
 0x14e   :  { %v456_v37 = vpop.f32.mrf.mxu0  ;;  %1283 = vmatmul.msk.f32.gmra.mxu1 %vm222_vm0, %v378_v45 }
 0x156   :  { %v459_v44 = vpop.f32.mrf.mxu0 }
 0x189   :  { %v269_v14 = vpop.permute.xlu1 %268 }
 0x18a   :  { %1274 = vmatmul.msk.f32.vlgmr.msra.gmra.mxu2 %vm149_vm1, %v269_v14 }
 0x18b   :  { %626 = vmatpush.msra.mxu2 %v605_v16  ;;  %v1361_v16 = vld [vmem:[%s2057_s18] ss:$0 sm:$0xff] }
 0x191   :  { %v271_v21 = vpop.permute.xlu1 %270 }
 0x192   :  { %1275 = vmatmul.msk.f32.gmra.mxu2 %vm149_vm1, %v271_v21 }
 0x19a   :  { %1284 = vmatmul.msk.f32.vlgmr.msrb.gmra.mxu2 %vm222_vm0, %v453_v30 }
 0x1a2   :  { %1285 = vmatmul.msk.f32.gmra.mxu2 %vm222_vm0, %v456_v37  ;;  %v680_v37 = vld [vmem:[%s2056_s17 + $0x18] sm:$0xff] }
 0x1aa   :  { %1286 = vmatmul.msk.f32.gmra.mxu2 %vm222_vm0, %v459_v44 }
 0x1cb   :  { %v414_v20 = vpop.f32.mrf.mxu1 }
 0x20d   :  { %v1892_v24 = vpop.f32.mrf.mxu2 }
 0x20e   :  { %v1276_v25 = vmul.f32 -1.442695, %v1892_v24 }
 0x210   :  { %1376 = vpow2.f32 %v1276_v25 }
 0x215   :  { %v296_v26 = vpop.f32.mrf.mxu2 }
 0x216   :  { %v1377_v27 = vpop.eup %1376  ;;  %v1277_v28 = vmul.f32 -1.442695, %v296_v26 }
 0x217   :  { %v305_v29 = vadd.f32 1.0, %v1377_v27 }
 0x218   :  { %1378 = vpow2.f32 %v1277_v28 }
 0x219   :  { %1380 = vrcp.f32 %v305_v29  ;;  %vm312_vm11 = vweird.f32 %v305_v29  ;;  %v318_v52 = vand.u32 2147483648, %v305_v29  ;;  %v316_v55 = vand.u32 2147483647, %v305_v29 }
 0x21b   :  { %v319_v61 = vor.u32 1.1754944e-38, %v318_v52  ;;  %vm317_vm2 = vcmp.eq.f32.partialorder %v316_v55, 8.507059e+37 }
 0x21d   :  { %v489_v14 = vpop.f32.mrf.mxu2 }
 0x21e   :  { %v1379_v34 = vpop.eup %1378 }
 0x21f   :  { %v1381_v35 = vpop.eup %1380  ;;  %v306_v36 = vadd.f32 1.0, %v1379_v34  ;;  %v604_v34 = vld [vmem:[%s2053_s14] sm:$0xff] }
 0x220   :  { %v308_v39 = vmul.f32 %v1381_v35, %v305_v29  ;;  %vm313_vm10 = vweird.f32 %v1381_v35  ;;  %627 = vmatpush.msra.mxu2 %v604_v34 }
 0x221   :  { %1382 = vrcp.f32 %v306_v36  ;;  %v333_v51 = vand.u32 2147483648, %v306_v36  ;;  %v331_v54 = vand.u32 2147483647, %v306_v36  ;;  %vm314_vm13 = vmor %vm312_vm11, %vm313_vm10  ;;  %vm327_vm14 = vweird.f32 %v306_v36 }
 0x222   :  { %v309_v40 = vsub.f32 1.0, %v308_v39  ;;  %v678_v39 = vld [vmem:[%s2056_s17 + $0x8] sm:$0xff] }
 0x223   :  { %v334_v60 = vor.u32 1.1754944e-38, %v333_v51  ;;  %vm332_vm0 = vcmp.eq.f32.partialorder %v331_v54, 8.507059e+37 }
 0x224   :  { %v310_v41 = vmul.f32 %v1381_v35, %v309_v40  ;;  %v677_v40 = vld [vmem:[%s2056_s17] sm:$0xff] }
 0x225   :  { %v492_v18 = vpop.f32.mrf.mxu2 }
 0x226   :  { %v311_v50 = vadd.f32 %v1381_v35, %v310_v41 }
 0x227   :  { %v1383_v42 = vpop.eup %1382 }
 0x228   :  { %v323_v46 = vmul.f32 %v1383_v42, %v306_v36  ;;  %vm328_vm12 = vweird.f32 %v1383_v42  ;;  %v315_v59 = vsel %vm314_vm13, %v1381_v35, %v311_v50 }
 0x229   :  { %vm329_vm15 = vmor %vm327_vm14, %vm328_vm12  ;;  %v320_v0 = vsel %vm317_vm2, %v319_v61, %v315_v59 }
 0x22a   :  { %v324_v48 = vsub.f32 1.0, %v323_v46  ;;  %v337_v4 = vmul.f32 %v320_v0, %v1892_v24  ;;  %v1360_v24 = vld [vmem:[#allocation2] ss:$0 sm:$0xff] }
 0x22b   :  { %vm568_vm7 = vcmp.eq.s32.totalorder %v564_v23, %v1360_v24  ;;  %vm569_vm9 = vcmp.eq.s32.totalorder %v565_v32, %v1360_v24 }
 0x22c   :  { %v325_v53 = vmul.f32 %v1383_v42, %v324_v48  ;;  %v1293_v31 = vsel %vm568_vm7, 1.0, %v1610_v2  ;;  %v1294_v33 = vsel %vm569_vm9, 1.0, %v1610_v2 }
 0x22d   :  { %v495_v22 = vpop.f32.mrf.mxu2 }
 0x22e   :  { %v326_v58 = vadd.f32 %v1383_v42, %v325_v53 }
 0x230   :  { %v330_v62 = vsel %vm329_vm15, %v1383_v42, %v326_v58 }
 0x231   :  { %v335_v63 = vsel %vm332_vm0, %v334_v60, %v330_v62 }
 0x232   :  { %v338_v1 = vmul.f32 %v335_v63, %v296_v26 }
 0x234   :  { %545 = vmatpush.msrb.mxu3 %v338_v1 }
 0x236   :  { %546 = vmatpush.msrb.mxu3 %v337_v4 }
 0x237   :  { %1290 = vmatmul.msk.f32.vlgmr.msrb.gmra.mxu3 %vm521_vm4, %v1287_v3 }
 0x238   :  { %703 = vmatpush.msra.mxu3 %v680_v37 }
 0x23a   :  { %704 = vmatpush.msra.mxu3 %v679_v38 }
 0x23c   :  { %705 = vmatpush.msra.mxu3 %v678_v39 }
 0x23e   :  { %706 = vmatpush.msra.mxu3 %v677_v40 }
 0x23f   :  { %1291 = vmatmul.msk.f32.gmra.mxu3 %vm521_vm4, %v1288_v7 }
 0x247   :  { %1292 = vmatmul.msk.f32.gmra.mxu3 %vm521_vm4, %v1289_v12 }
 0x2ba   :  { %v548_v15 = vpop.f32.mrf.mxu3 }
 0x2bb   :  { %v557_v27 = vmul.f32 %v548_v15, %v408_v13  ;;  %v756_v15 = vld [vmem:[#allocation10 + $0x10] sm:$0xff] }
 0x2bd   :  { %v560_v30 = vmul.f32 %v557_v27, %v489_v14 }
 0x2c2   :  { %v551_v19 = vpop.f32.mrf.mxu3 }
 0x2c3   :  { %v558_v25 = vmul.f32 %v551_v19, %v411_v17  ;;  %v755_v17 = vld [vmem:[#allocation10 + $0x8] sm:$0xff] }
 0x2c5   :  { %v561_v29 = vmul.f32 %v558_v25, %v492_v18  ;;  %v754_v18 = vld [vmem:[#allocation10] sm:$0xff] }
 0x2ca   :  { %v554_v21 = vpop.f32.mrf.mxu3 }
 0x2cb   :  { %v559_v26 = vmul.f32 %v554_v21, %v414_v20 }
 0x2cd   :  { %v562_v28 = vmul.f32 %v559_v26, %v495_v22 }
 0x2cf   :  { %594 = vmatpush.msra.mxu1 %v562_v28 }
 0x2d1   :  { %595 = vmatpush.msra.mxu1 %v561_v29 }
 0x2d3   :  { %596 = vmatpush.msra.mxu1 %v560_v30 }
 0x2d4   :  { %1295 = vmatmul.msk.f32.vlgmr.msra.gmra.mxu1 %vm574_vm8, %v1293_v31 }
 0x2dc   :  { %1296 = vmatmul.msk.f32.gmra.mxu1 %vm574_vm8, %v1294_v33 }
 0x351   :  { %v598_v35 = vpop.f32.mrf.mxu1 }
 0x352   :  { %1297 = vmatmul.msk.f32.vlgmr.msra.gmra.mxu2 %vm521_vm4, %v598_v35 }
 0x359   :  { %v601_v36 = vpop.f32.mrf.mxu1 }
 0x35a   :  { %1298 = vmatmul.msk.f32.gmra.mxu2 %vm521_vm4, %v601_v36 }
 0x3d5   :  { %v629_v41 = vpop.f32.mrf.mxu2 }
 0x3d6   :  { %v1299_v42 = vmul.f32 -1.442695, %v629_v41 }
 0x3d8   :  { %1384 = vpow2.f32 %v1299_v42 }
 0x3dd   :  { %v632_v44 = vpop.f32.mrf.mxu2 }
 0x3de   :  { %v1385_v45 = vpop.eup %1384  ;;  %v1300_v46 = vmul.f32 -1.442695, %v632_v44 }
 0x3df   :  { %v641_v47 = vadd.f32 1.0, %v1385_v45 }
 0x3e0   :  { %1386 = vpow2.f32 %v1300_v46 }
 0x3e1   :  { %1388 = vrcp.f32 %v641_v47  ;;  %v654_v54 = vand.u32 2147483648, %v641_v47  ;;  %v652_v56 = vand.u32 2147483647, %v641_v47  ;;  %vm648_vm11 = vweird.f32 %v641_v47 }
 0x3e3   :  { %v655_v59 = vor.u32 1.1754944e-38, %v654_v54  ;;  %vm653_vm13 = vcmp.eq.f32.partialorder %v652_v56, 8.507059e+37  ;;  %v835_v54 = vld [vmem:[%s2054_s15 + $0x10] sm:$0xff] }
 0x3e6   :  { %v1387_v48 = vpop.eup %1386 }
 0x3e7   :  { %v1389_v50 = vpop.eup %1388  ;;  %v642_v51 = vadd.f32 1.0, %v1387_v48 }
 0x3e8   :  { %v644_v52 = vmul.f32 %v1389_v50, %v641_v47  ;;  %vm649_vm10 = vweird.f32 %v1389_v50 }
 0x3e9   :  { %1390 = vrcp.f32 %v642_v51  ;;  %vm650_vm12 = vmor %vm648_vm11, %vm649_vm10  ;;  %vm663_vm14 = vweird.f32 %v642_v51  ;;  %v669_v1 = vand.u32 2147483648, %v642_v51  ;;  %v667_v4 = vand.u32 2147483647, %v642_v51 }
 0x3ea   :  { %v645_v53 = vsub.f32 1.0, %v644_v52  ;;  %v836_v52 = vld [vmem:[%s2054_s15 + $0x18] sm:$0xff] }
 0x3eb   :  { %v670_v7 = vor.u32 1.1754944e-38, %v669_v1  ;;  %vm668_vm2 = vcmp.eq.f32.partialorder %v667_v4, 8.507059e+37  ;;  %859 = vmatpush.msra.mxu0 %v836_v52  ;;  %1341 = vmatpush.msrb.mxu2 %v836_v52 }
 0x3ec   :  { %v646_v55 = vmul.f32 %v1389_v50, %v645_v53  ;;  %v1362_v53 = vld [vmem:[%s2059_s20] ss:$0 sm:$0xff] }
 0x3ed   :  { %860 = vmatpush.msra.mxu0 %v835_v54  ;;  %1342 = vmatpush.msrb.mxu2 %v835_v54 }
 0x3ee   :  { %v647_v57 = vadd.f32 %v1389_v50, %v646_v55  ;;  %v834_v55 = vld [vmem:[%s2054_s15 + $0x8] sm:$0xff] }
 0x3ef   :  { %v1391_v58 = vpop.eup %1390  ;;  %861 = vmatpush.msra.mxu0 %v834_v55  ;;  %1343 = vmatpush.msrb.mxu2 %v834_v55 }
 0x3f0   :  { %v651_v60 = vsel %vm650_vm12, %v1389_v50, %v647_v57  ;;  %v659_v61 = vmul.f32 %v1391_v58, %v642_v51  ;;  %vm664_vm15 = vweird.f32 %v1391_v58 }
 0x3f1   :  { %v656_v62 = vsel %vm653_vm13, %v655_v59, %v651_v60  ;;  %vm665_vm0 = vmor %vm663_vm14, %vm664_vm15 }
 0x3f2   :  { %v673_v63 = vmul.f32 %v656_v62, %v629_v41  ;;  %v660_v0 = vsub.f32 1.0, %v659_v61 }
 0x3f4   :  { %v1929_v2 = vadd.f32 %v673_v63, %v1794_v43  ;;  %v661_v3 = vmul.f32 %v1391_v58, %v660_v0  ;;  %v757_v43 = vld [vmem:[#allocation10 + $0x18] sm:$0xff] }
 0x3f5   :  { %780 = vmatpush.msrb.mxu1 %v757_v43 }
 0x3f6   :  { %v662_v5 = vadd.f32 %v1391_v58, %v661_v3  ;;  %1301 = vmatmul.msk.f32.vlgmr.msra.gmra.mxu3 %vm149_vm1, %v1929_v2 }
 0x3f7   :  { %781 = vmatpush.msrb.mxu1 %v756_v15 }
 0x3f8   :  { %v666_v11 = vsel %vm665_vm0, %v1391_v58, %v662_v5  ;;  %v833_v58 = vld [vmem:[%s2054_s15] sm:$0xff] }
 0x3f9   :  { %v671_v12 = vsel %vm668_vm2, %v670_v7, %v666_v11  ;;  %782 = vmatpush.msrb.mxu1 %v755_v17  ;;  %862 = vmatpush.msra.mxu0 %v833_v58 }
 0x3fa   :  { %v674_v13 = vmul.f32 %v671_v12, %v632_v44  ;;  %1344 = vmatpush.msrb.mxu2 %v833_v58 }
 0x3fb   :  { %783 = vmatpush.msrb.mxu1 %v754_v18 }
 0x3fc   :  { %v1934_v14 = vadd.f32 %v674_v13, %v1797_v49 }
 0x3fe   :  { %1302 = vmatmul.msk.f32.gmra.mxu3 %vm149_vm1, %v1934_v14 }
 0x479   :  { %v708_v19 = vpop.f32.mrf.mxu3 }
 0x47a   :  { %v709_v20 = vadd.f32 %v1361_v16, %v708_v19 }
 0x47c   :  { %v1303_v21 = vmul.f32 -1.442695, %v709_v20 }
 0x47e   :  { %1392 = vpow2.f32 %v1303_v21 }
 0x481   :  { %v711_v49 = vpop.f32.mrf.mxu3 }
 0x482   :  { %v712_v22 = vadd.f32 %v1361_v16, %v711_v49 }
 0x484   :  { %v1393_v23 = vpop.eup %1392  ;;  %v1304_v24 = vmul.f32 -1.442695, %v712_v22 }
 0x485   :  { %v720_v25 = vadd.f32 1.0, %v1393_v23 }
 0x486   :  { %1394 = vpow2.f32 %v1304_v24 }
 0x487   :  { %1396 = vrcp.f32 %v720_v25  ;;  %v733_v31 = vand.u32 2147483648, %v720_v25  ;;  %v731_v33 = vand.u32 2147483647, %v720_v25  ;;  %vm727_vm4 = vweird.f32 %v720_v25 }
 0x489   :  { %v734_v36 = vor.u32 1.1754944e-38, %v733_v31  ;;  %vm732_vm6 = vcmp.eq.f32.partialorder %v731_v33, 8.507059e+37  ;;  %v1363_v31 = vld [vmem:[%s2055_s16] ss:$0 sm:$0xff] }
 0x48c   :  { %v1395_v26 = vpop.eup %1394 }
 0x48d   :  { %v1397_v27 = vpop.eup %1396  ;;  %v721_v28 = vadd.f32 1.0, %v1395_v26 }
 0x48e   :  { %v723_v29 = vmul.f32 %v1397_v27, %v720_v25  ;;  %vm728_vm3 = vweird.f32 %v1397_v27 }
 0x48f   :  { %1398 = vrcp.f32 %v721_v28  ;;  %vm729_vm5 = vmor %vm727_vm4, %vm728_vm3  ;;  %v748_v42 = vand.u32 2147483648, %v721_v28  ;;  %v746_v45 = vand.u32 2147483647, %v721_v28  ;;  %vm742_vm8 = vweird.f32 %v721_v28 }
 0x490   :  { %v724_v30 = vsub.f32 1.0, %v723_v29 }
 0x491   :  { %v749_v47 = vor.u32 1.1754944e-38, %v748_v42  ;;  %vm747_vm10 = vcmp.eq.f32.partialorder %v746_v45, 8.507059e+37 }
 0x492   :  { %v725_v32 = vmul.f32 %v1397_v27, %v724_v30 }
 0x494   :  { %v726_v34 = vadd.f32 %v1397_v27, %v725_v32  ;;  %v1315_v32 = vld [vmem:[%s2056_s17 + $0x30] sm:$0xff] }
 0x495   :  { %v1399_v35 = vpop.eup %1398 }
 0x496   :  { %v730_v37 = vsel %vm729_vm5, %v1397_v27, %v726_v34  ;;  %v738_v38 = vmul.f32 %v1399_v35, %v721_v28  ;;  %vm743_vm7 = vweird.f32 %v1399_v35 }
 0x497   :  { %v735_v39 = vsel %vm732_vm6, %v734_v36, %v730_v37  ;;  %vm744_vm9 = vmor %vm742_vm8, %vm743_vm7 }
 0x498   :  { %v752_v40 = vmul.f32 %v735_v39, %v709_v20  ;;  %v739_v41 = vsub.f32 1.0, %v738_v38 }
 0x49a   :  { %v740_v44 = vmul.f32 %v1399_v35, %v739_v41  ;;  %1305 = vmatmul.msk.f32.vlgmr.msrb.gmra.mxu1 %vm149_vm1, %v752_v40 }
 0x49c   :  { %v741_v46 = vadd.f32 %v1399_v35, %v740_v44 }
 0x49e   :  { %v745_v48 = vsel %vm744_vm9, %v1399_v35, %v741_v46  ;;  %v1313_v35 = vld [vmem:[%s2056_s17 + $0x20] sm:$0xff] }
 0x49f   :  { %v750_v50 = vsel %vm747_vm10, %v749_v47, %v745_v48 }
 0x4a0   :  { %v753_v51 = vmul.f32 %v750_v50, %v712_v22 }
 0x4a2   :  { %1306 = vmatmul.msk.f32.gmra.mxu1 %vm149_vm1, %v753_v51 }
 0x517   :  { %v785_v56 = vpop.f32.mrf.mxu1 }
 0x518   :  { %v786_v57 = vadd.f32 %v1362_v53, %v785_v56 }
 0x51a   :  { %v1307_v59 = vmul.f32 -1.442695, %v786_v57 }
 0x51c   :  { %1400 = vpow2.f32 %v1307_v59 }
 0x51f   :  { %v788_v60 = vpop.f32.mrf.mxu1 }
 0x520   :  { %v789_v61 = vadd.f32 %v1362_v53, %v788_v60 }
 0x522   :  { %v1401_v62 = vpop.eup %1400  ;;  %v1308_v63 = vmul.f32 -1.442695, %v789_v61 }
 0x523   :  { %v797_v0 = vadd.f32 1.0, %v1401_v62 }
 0x524   :  { %1402 = vpow2.f32 %v1308_v63 }
 0x525   :  { %1404 = vrcp.f32 %v797_v0  ;;  %v810_v11 = vand.u32 2147483648, %v797_v0  ;;  %v808_v13 = vand.u32 2147483647, %v797_v0  ;;  %vm804_vm12 = vweird.f32 %v797_v0 }
 0x527   :  { %v811_v16 = vor.u32 1.1754944e-38, %v810_v11  ;;  %vm809_vm14 = vcmp.eq.f32.partialorder %v808_v13, 8.507059e+37  ;;  %v994_v11 = vld [vmem:[#allocation10 + $0x30] sm:$0xff]  ;;  %v993_v13 = vld [vmem:[#allocation10 + $0x28] sm:$0xff] }
 0x52a   :  { %v1403_v1 = vpop.eup %1402 }
 0x52b   :  { %v1405_v3 = vpop.eup %1404  ;;  %v798_v4 = vadd.f32 1.0, %v1403_v1 }
 0x52c   :  { %v800_v5 = vmul.f32 %v1405_v3, %v797_v0  ;;  %vm805_vm11 = vweird.f32 %v1405_v3 }
 0x52d   :  { %1406 = vrcp.f32 %v798_v4  ;;  %vm806_vm13 = vmor %vm804_vm12, %vm805_vm11  ;;  %v825_v49 = vand.u32 2147483648, %v798_v4  ;;  %v823_v24 = vand.u32 2147483647, %v798_v4  ;;  %vm819_vm0 = vweird.f32 %v798_v4 }
 0x52e   :  { %v801_v7 = vsub.f32 1.0, %v800_v5 }
 0x52f   :  { %v826_v26 = vor.u32 1.1754944e-38, %v825_v49  ;;  %vm824_vm3 = vcmp.eq.f32.partialorder %v823_v24, 8.507059e+37 }
 0x530   :  { %v802_v12 = vmul.f32 %v1405_v3, %v801_v7  ;;  %v995_v7 = vld [vmem:[#allocation10 + $0x38] sm:$0xff] }
 0x531   :  { %1019 = vmatpush.msrb.mxu3 %v995_v7 }
 0x532   :  { %v803_v43 = vadd.f32 %v1405_v3, %v802_v12  ;;  %v1364_v12 = vld [vmem:[%s2057_s18 + $0x1] ss:$0 sm:$0xff] }
 0x533   :  { %v1407_v15 = vpop.eup %1406  ;;  %1020 = vmatpush.msrb.mxu3 %v994_v11 }
 0x534   :  { %v807_v17 = vsel %vm806_vm13, %v1405_v3, %v803_v43  ;;  %v815_v18 = vmul.f32 %v1407_v15, %v798_v4  ;;  %vm820_vm15 = vweird.f32 %v1407_v15  ;;  %v992_v43 = vld [vmem:[#allocation10 + $0x20] sm:$0xff] }
 0x535   :  { %v812_v19 = vsel %vm809_vm14, %v811_v16, %v807_v17  ;;  %vm821_vm2 = vmor %vm819_vm0, %vm820_vm15  ;;  %1021 = vmatpush.msrb.mxu3 %v993_v13 }
 0x536   :  { %v829_v20 = vmul.f32 %v812_v19, %v786_v57  ;;  %v816_v21 = vsub.f32 1.0, %v815_v18 }
 0x537   :  { %1022 = vmatpush.msrb.mxu3 %v992_v43 }
 0x538   :  { %v831_v22 = vadd.f32 %v829_v20, %v1929_v2  ;;  %v817_v23 = vmul.f32 %v1407_v15, %v816_v21  ;;  %v1316_v2 = vld [vmem:[%s2056_s17 + $0x38] sm:$0xff] }
 0x539   :  { %940 = vmatpush.msra.mxu2 %v1316_v2 }
 0x53a   :  { %v818_v25 = vadd.f32 %v1407_v15, %v817_v23  ;;  %1309 = vmatmul.msk.f32.vlgmr.msra.gmra.mxu0 %vm149_vm1, %v831_v22 }
 0x53b   :  { %941 = vmatpush.msra.mxu2 %v1315_v32 }
 0x53c   :  { %v822_v27 = vsel %vm821_vm2, %v1407_v15, %v818_v25 }
 0x53d   :  { %v827_v28 = vsel %vm824_vm3, %v826_v26, %v822_v27 }
 0x53e   :  { %v830_v29 = vmul.f32 %v827_v28, %v789_v61 }
 0x540   :  { %v832_v30 = vadd.f32 %v830_v29, %v1934_v14  ;;  %v1314_v14 = vld [vmem:[%s2056_s17 + $0x28] sm:$0xff] }
 0x541   :  { %942 = vmatpush.msra.mxu2 %v1314_v14 }
 0x542   :  { %1310 = vmatmul.msk.f32.vlgmr.msrb.gmra.mxu2 %vm149_vm1, %v832_v30 }
 0x543   :  { %943 = vmatpush.msra.mxu2 %v1313_v35 }
 0x5b7   :  { %v864_v33 = vpop.f32.mrf.mxu0 }
 0x5b8   :  { %v865_v34 = vadd.f32 %v1363_v31, %v864_v33 }
 0x5ba   :  { %v1311_v36 = vmul.f32 -1.442695, %v865_v34 }
 0x5bc   :  { %1408 = vpow2.f32 %v1311_v36 }
 0x5c2   :  { %v1409_v37 = vpop.eup %1408 }
 0x5c3   :  { %v876_v38 = vadd.f32 1.0, %v1409_v37 }
 0x5c5   :  { %1410 = vrcp.f32 %v876_v38  ;;  %v867_v39 = vpop.f32.mrf.mxu2  ;;  %v889_v46 = vand.u32 2147483648, %v876_v38  ;;  %v887_v50 = vand.u32 2147483647, %v876_v38  ;;  %vm883_vm5 = vweird.f32 %v876_v38 }
 0x5c6   :  { %v868_v40 = vadd.f32 %v1363_v31, %v867_v39 }
 0x5c7   :  { %v890_v53 = vor.u32 1.1754944e-38, %v889_v46  ;;  %vm888_vm7 = vcmp.eq.f32.partialorder %v887_v50, 8.507059e+37  ;;  %v1329_v46 = vld [vmem:[%s2056_s17 + $0x50] sm:$0xff] }
 0x5c8   :  { %v1312_v41 = vmul.f32 -1.442695, %v868_v40 }
 0x5ca   :  { %1412 = vpow2.f32 %v1312_v41 }
 0x5cb   :  { %v1411_v42 = vpop.eup %1410 }
 0x5cc   :  { %v879_v44 = vmul.f32 %v1411_v42, %v876_v38  ;;  %vm884_vm4 = vweird.f32 %v1411_v42 }
 0x5cd   :  { %vm885_vm6 = vmor %vm883_vm5, %vm884_vm4 }
 0x5ce   :  { %v880_v45 = vsub.f32 1.0, %v879_v44  ;;  %v1330_v44 = vld [vmem:[%s2056_s17 + $0x58] sm:$0xff] }
 0x5cf   :  { %1100 = vmatpush.msra.mxu1 %v1330_v44 }
 0x5d0   :  { %v1413_v47 = vpop.eup %1412  ;;  %v881_v48 = vmul.f32 %v1411_v42, %v880_v45  ;;  %v1365_v45 = vld [vmem:[%s2059_s20 + $0x1] ss:$0 sm:$0xff] }
 0x5d1   :  { %v877_v51 = vadd.f32 1.0, %v1413_v47  ;;  %1101 = vmatpush.msra.mxu1 %v1329_v46  ;;  %v1328_v47 = vld [vmem:[%s2056_s17 + $0x48] sm:$0xff] }
 0x5d2   :  { %v882_v52 = vadd.f32 %v1411_v42, %v881_v48 }
 0x5d3   :  { %1414 = vrcp.f32 %v877_v51  ;;  %v904_v61 = vand.u32 2147483648, %v877_v51  ;;  %v902_v63 = vand.u32 2147483647, %v877_v51  ;;  %vm898_vm9 = vweird.f32 %v877_v51  ;;  %1102 = vmatpush.msra.mxu1 %v1328_v47 }
 0x5d4   :  { %v886_v54 = vsel %vm885_vm6, %v1411_v42, %v882_v52 }
 0x5d5   :  { %v891_v55 = vsel %vm888_vm7, %v890_v53, %v886_v54  ;;  %v905_v1 = vor.u32 1.1754944e-38, %v904_v61  ;;  %vm903_vm11 = vcmp.eq.f32.partialorder %v902_v63, 8.507059e+37 }
 0x5d6   :  { %v908_v56 = vmul.f32 %v891_v55, %v865_v34 }
 0x5d8   :  { %v1978_v57 = vadd.f32 %v908_v56, %v1759_v6 }
 0x5d9   :  { %v1415_v58 = vpop.eup %1414 }
 0x5da   :  { %v894_v59 = vmul.f32 %v1415_v58, %v877_v51  ;;  %1318 = vmatmul.msk.f32.vlgmr.msra.gmra.mxu2 %vm149_vm1, %v1978_v57  ;;  %vm899_vm8 = vweird.f32 %v1415_v58  ;;  %v1327_v51 = vld [vmem:[%s2056_s17 + $0x40] sm:$0xff] }
 0x5db   :  { %vm900_vm10 = vmor %vm898_vm9, %vm899_vm8  ;;  %1103 = vmatpush.msra.mxu1 %v1327_v51 }
 0x5dc   :  { %v895_v60 = vsub.f32 1.0, %v894_v59 }
 0x5de   :  { %v896_v62 = vmul.f32 %v1415_v58, %v895_v60 }
 0x5e0   :  { %v897_v0 = vadd.f32 %v1415_v58, %v896_v62 }
 0x5e2   :  { %v901_v3 = vsel %vm900_vm10, %v1415_v58, %v897_v0 }
 0x5e3   :  { %v906_v4 = vsel %vm903_vm11, %v905_v1, %v901_v3 }
 0x5e4   :  { %v909_v5 = vmul.f32 %v906_v4, %v868_v40 }
 0x5e6   :  { %v1983_v6 = vadd.f32 %v909_v5, %v1770_v8 }
 0x5e8   :  { %1319 = vmatmul.msk.f32.gmra.mxu2 %vm149_vm1, %v1983_v6 }
 0x65d   :  { %v945_v15 = vpop.f32.mrf.mxu2 }
 0x65e   :  { %v946_v16 = vadd.f32 %v1364_v12, %v945_v15 }
 0x660   :  { %v1320_v17 = vmul.f32 -1.442695, %v946_v16 }
 0x662   :  { %1416 = vpow2.f32 %v1320_v17 }
 0x668   :  { %v1417_v8 = vpop.eup %1416 }
 0x669   :  { %v957_v18 = vadd.f32 1.0, %v1417_v8 }
 0x66b   :  { %1418 = vrcp.f32 %v957_v18  ;;  %v948_v19 = vpop.f32.mrf.mxu2  ;;  %v970_v24 = vand.u32 2147483648, %v957_v18  ;;  %v968_v27 = vand.u32 2147483647, %v957_v18  ;;  %vm964_vm13 = vweird.f32 %v957_v18 }
 0x66c   :  { %v949_v20 = vadd.f32 %v1364_v12, %v948_v19 }
 0x66d   :  { %v971_v30 = vor.u32 1.1754944e-38, %v970_v24  ;;  %vm969_vm15 = vcmp.eq.f32.partialorder %v968_v27, 8.507059e+37  ;;  %v1154_v24 = vld [vmem:[#allocation10 + $0x50] sm:$0xff]  ;;  %v1152_v27 = vld [vmem:[#allocation10 + $0x40] sm:$0xff] }
 0x66e   :  { %v1321_v21 = vmul.f32 -1.442695, %v949_v20 }
 0x670   :  { %1420 = vpow2.f32 %v1321_v21 }
 0x671   :  { %v1419_v49 = vpop.eup %1418 }
 0x672   :  { %v960_v22 = vmul.f32 %v1419_v49, %v957_v18  ;;  %vm965_vm12 = vweird.f32 %v1419_v49 }
 0x673   :  { %vm966_vm14 = vmor %vm964_vm13, %vm965_vm12 }
 0x674   :  { %v961_v23 = vsub.f32 1.0, %v960_v22 }
 0x676   :  { %v1421_v25 = vpop.eup %1420  ;;  %v962_v26 = vmul.f32 %v1419_v49, %v961_v23  ;;  %v1155_v23 = vld [vmem:[#allocation10 + $0x58] sm:$0xff] }
 0x677   :  { %v958_v28 = vadd.f32 1.0, %v1421_v25  ;;  %1179 = vmatpush.msrb.mxu0 %v1155_v23  ;;  %v1366_v25 = vld [vmem:[%s2057_s18 + $0x2] ss:$0 sm:$0xff] }
 0x678   :  { %v963_v29 = vadd.f32 %v1419_v49, %v962_v26  ;;  %v1153_v26 = vld [vmem:[#allocation10 + $0x48] sm:$0xff] }
 0x679   :  { %1422 = vrcp.f32 %v958_v28  ;;  %v985_v35 = vand.u32 2147483648, %v958_v28  ;;  %v983_v37 = vand.u32 2147483647, %v958_v28  ;;  %vm979_vm2 = vweird.f32 %v958_v28  ;;  %1180 = vmatpush.msrb.mxu0 %v1154_v24 }
 0x67a   :  { %v967_v2 = vsel %vm966_vm14, %v1419_v49, %v963_v29 }
 0x67b   :  { %v972_v31 = vsel %vm969_vm15, %v971_v30, %v967_v2  ;;  %v986_v39 = vor.u32 1.1754944e-38, %v985_v35  ;;  %vm984_vm4 = vcmp.eq.f32.partialorder %v983_v37, 8.507059e+37  ;;  %1181 = vmatpush.msrb.mxu0 %v1153_v26 }
 0x67c   :  { %v989_v32 = vmul.f32 %v972_v31, %v946_v16 }
 0x67d   :  { %1182 = vmatpush.msrb.mxu0 %v1152_v27 }
 0x67e   :  { %1323 = vmatmul.msk.f32.vlgmr.msrb.gmra.mxu3 %vm149_vm1, %v989_v32 }
 0x67f   :  { %v1423_v14 = vpop.eup %1422 }
 0x680   :  { %v975_v33 = vmul.f32 %v1423_v14, %v958_v28  ;;  %vm980_vm0 = vweird.f32 %v1423_v14 }
 0x681   :  { %vm981_vm3 = vmor %vm979_vm2, %vm980_vm0 }
 0x682   :  { %v976_v34 = vsub.f32 1.0, %v975_v33 }
 0x684   :  { %v977_v36 = vmul.f32 %v1423_v14, %v976_v34 }
 0x686   :  { %v978_v38 = vadd.f32 %v1423_v14, %v977_v36 }
 0x688   :  { %v982_v40 = vsel %vm981_vm3, %v1423_v14, %v978_v38 }
 0x689   :  { %v987_v41 = vsel %vm984_vm4, %v986_v39, %v982_v40 }
 0x68a   :  { %v990_v42 = vmul.f32 %v987_v41, %v949_v20 }
 0x68c   :  { %1324 = vmatmul.msk.f32.gmra.mxu3 %vm149_vm1, %v990_v42 }
 0x701   :  { %v1024_v48 = vpop.f32.mrf.mxu3 }
 0x702   :  { %v1025_v50 = vadd.f32 %v1365_v45, %v1024_v48 }
 0x704   :  { %v1325_v52 = vmul.f32 -1.442695, %v1025_v50 }
 0x706   :  { %1424 = vpow2.f32 %v1325_v52 }
 0x70c   :  { %v1425_v53 = vpop.eup %1424 }
 0x70d   :  { %v1036_v54 = vadd.f32 1.0, %v1425_v53 }
 0x70f   :  { %1426 = vrcp.f32 %v1036_v54  ;;  %v1027_v55 = vpop.f32.mrf.mxu3  ;;  %v1049_v62 = vand.u32 2147483648, %v1036_v54  ;;  %v1047_v1 = vand.u32 2147483647, %v1036_v54  ;;  %vm1043_vm6 = vweird.f32 %v1036_v54 }
 0x710   :  { %v1028_v56 = vadd.f32 %v1365_v45, %v1027_v55 }
 0x711   :  { %v1050_v5 = vor.u32 1.1754944e-38, %v1049_v62  ;;  %vm1048_vm8 = vcmp.eq.f32.partialorder %v1047_v1, 8.507059e+37 }
 0x712   :  { %v1326_v58 = vmul.f32 -1.442695, %v1028_v56 }
 0x714   :  { %1428 = vpow2.f32 %v1326_v58 }
 0x715   :  { %v1427_v59 = vpop.eup %1426 }
 0x716   :  { %v1039_v60 = vmul.f32 %v1427_v59, %v1036_v54  ;;  %vm1044_vm5 = vweird.f32 %v1427_v59 }
 0x717   :  { %vm1045_vm7 = vmor %vm1043_vm6, %vm1044_vm5 }
 0x718   :  { %v1040_v61 = vsub.f32 1.0, %v1039_v60  ;;  %v1367_v60 = vld [vmem:[%s2059_s20 + $0x2] ss:$0 sm:$0xff]  ;;  %s1611_s20 = smov [#allocation11]  }
 0x719   :  { %s1251_s15 = sshll.u32 %s1611_s20, 4  ;;  %s1252_s15 = int_to_ptr.vmem [resolvable:$true] %s1251_s15 }
 0x71a   :  { %v1429_v63 = vpop.eup %1428  ;;  %v1041_v0 = vmul.f32 %v1427_v59, %v1040_v61 }
 0x71b   :  { %v1037_v3 = vadd.f32 1.0, %v1429_v63 }
 0x71c   :  { %v1042_v4 = vadd.f32 %v1427_v59, %v1041_v0 }
 0x71d   :  { %1430 = vrcp.f32 %v1037_v3  ;;  %v1064_v17 = vand.u32 2147483648, %v1037_v3  ;;  %v1062_v18 = vand.u32 2147483647, %v1037_v3  ;;  %vm1058_vm10 = vweird.f32 %v1037_v3 }
 0x71e   :  { %v1046_v7 = vsel %vm1045_vm7, %v1427_v59, %v1042_v4 }
 0x71f   :  { %v1051_v11 = vsel %vm1048_vm8, %v1050_v5, %v1046_v7  ;;  %v1065_v20 = vor.u32 1.1754944e-38, %v1064_v17  ;;  %vm1063_vm12 = vcmp.eq.f32.partialorder %v1062_v18, 8.507059e+37 }
 0x720   :  { %v1068_v12 = vmul.f32 %v1051_v11, %v1025_v50 }
 0x722   :  { %v2008_v13 = vadd.f32 %v1068_v12, %v1978_v57 }
 0x723   :  { %v1431_v43 = vpop.eup %1430 }
 0x724   :  { %v1054_v15 = vmul.f32 %v1431_v43, %v1037_v3  ;;  %1332 = vmatmul.msk.f32.vlgmr.msra.gmra.mxu1 %vm149_vm1, %v2008_v13  ;;  %vm1059_vm9 = vweird.f32 %v1431_v43 }
 0x725   :  { %vm1060_vm11 = vmor %vm1058_vm10, %vm1059_vm9 }
 0x726   :  { %v1055_v16 = vsub.f32 1.0, %v1054_v15 }
 0x728   :  { %v1056_v8 = vmul.f32 %v1431_v43, %v1055_v16 }
 0x72a   :  { %v1057_v19 = vadd.f32 %v1431_v43, %v1056_v8 }
 0x72c   :  { %v1061_v21 = vsel %vm1060_vm11, %v1431_v43, %v1057_v19 }
 0x72d   :  { %v1066_v49 = vsel %vm1063_vm12, %v1065_v20, %v1061_v21 }
 0x72e   :  { %v1069_v22 = vmul.f32 %v1066_v49, %v1028_v56 }
 0x730   :  { %v2013_v57 = vadd.f32 %v1069_v22, %v1983_v6 }
 0x732   :  { %1333 = vmatmul.msk.f32.gmra.mxu1 %vm149_vm1, %v2013_v57 }
 0x7a1   :  { %v1105_v28 = vpop.f32.mrf.mxu1 }
 0x7a2   :  { %v1106_v29 = vadd.f32 %v1366_v25, %v1105_v28 }
 0x7a4   :  { %v1334_v30 = vmul.f32 -1.442695, %v1106_v29 }
 0x7a6   :  { %1432 = vpow2.f32 %v1334_v30 }
 0x7ac   :  { %v1433_v6 = vpop.eup %1432 }
 0x7ad   :  { %v1117_v2 = vadd.f32 1.0, %v1433_v6 }
 0x7af   :  { %1434 = vrcp.f32 %v1117_v2  ;;  %v1108_v31 = vpop.f32.mrf.mxu1  ;;  %v1130_v36 = vand.u32 2147483648, %v1117_v2  ;;  %v1128_v39 = vand.u32 2147483647, %v1117_v2  ;;  %vm1124_vm14 = vweird.f32 %v1117_v2 }
 0x7b0   :  { %v1109_v32 = vadd.f32 %v1366_v25, %v1108_v31 }
 0x7b1   :  { %v1131_v42 = vor.u32 1.1754944e-38, %v1130_v36  ;;  %vm1129_vm0 = vcmp.eq.f32.partialorder %v1128_v39, 8.507059e+37 }
 0x7b2   :  { %v1335_v14 = vmul.f32 -1.442695, %v1109_v32 }
 0x7b4   :  { %1436 = vpow2.f32 %v1335_v14 }
 0x7b5   :  { %v1435_v33 = vpop.eup %1434 }
 0x7b6   :  { %v1120_v34 = vmul.f32 %v1435_v33, %v1117_v2  ;;  %vm1125_vm13 = vweird.f32 %v1435_v33 }
 0x7b7   :  { %vm1126_vm15 = vmor %vm1124_vm14, %vm1125_vm13  ;;  %vm1244_vm14 = vcmask 523264  }
 0x7b8   :  { %v1121_v35 = vsub.f32 1.0, %v1120_v34 }
 0x7ba   :  { %v1437_v37 = vpop.eup %1436  ;;  %v1122_v38 = vmul.f32 %v1435_v33, %v1121_v35 }
 0x7bb   :  { %v1118_v40 = vadd.f32 1.0, %v1437_v37 }
 0x7bc   :  { %v1123_v41 = vadd.f32 %v1435_v33, %v1122_v38 }
 0x7bd   :  { %1438 = vrcp.f32 %v1118_v40  ;;  %v1145_v51 = vand.u32 2147483648, %v1118_v40  ;;  %v1143_v53 = vand.u32 2147483647, %v1118_v40  ;;  %vm1139_vm3 = vweird.f32 %v1118_v40 }
 0x7be   :  { %v1127_v44 = vsel %vm1126_vm15, %v1435_v33, %v1123_v41 }
 0x7bf   :  { %v1132_v45 = vsel %vm1129_vm0, %v1131_v42, %v1127_v44  ;;  %v1146_v55 = vor.u32 1.1754944e-38, %v1145_v51  ;;  %vm1144_vm5 = vcmp.eq.f32.partialorder %v1143_v53, 8.507059e+37 }
 0x7c0   :  { %v1149_v46 = vmul.f32 %v1132_v45, %v1106_v29 }
 0x7c2   :  { %1337 = vmatmul.msk.f32.vlgmr.msrb.gmra.mxu0 %vm149_vm1, %v1149_v46 }
 0x7c3   :  { %v1439_v47 = vpop.eup %1438 }
 0x7c4   :  { %v1135_v48 = vmul.f32 %v1439_v47, %v1118_v40  ;;  %vm1140_vm2 = vweird.f32 %v1439_v47 }
 0x7c5   :  { %vm1141_vm4 = vmor %vm1139_vm3, %vm1140_vm2 }
 0x7c6   :  { %v1136_v50 = vsub.f32 1.0, %v1135_v48 }
 0x7c8   :  { %v1137_v52 = vmul.f32 %v1439_v47, %v1136_v50 }
 0x7ca   :  { %v1138_v54 = vadd.f32 %v1439_v47, %v1137_v52 }
 0x7cc   :  { %v1142_v56 = vsel %vm1141_vm4, %v1439_v47, %v1138_v54 }
 0x7cd   :  { %v1147_v58 = vsel %vm1144_vm5, %v1146_v55, %v1142_v56 }
 0x7ce   :  { %v1150_v59 = vmul.f32 %v1147_v58, %v1109_v32 }
 0x7d0   :  { %1338 = vmatmul.msk.f32.gmra.mxu0 %vm149_vm1, %v1150_v59 }
 0x83f   :  { %v1184_v61 = vpop.f32.mrf.mxu0 }
 0x840   :  { %v1185_v62 = vadd.f32 %v1367_v60, %v1184_v61 }
 0x842   :  { %v1339_v63 = vmul.f32 -1.442695, %v1185_v62 }
 0x844   :  { %1440 = vpow2.f32 %v1339_v63 }
 0x84a   :  { %v1441_v0 = vpop.eup %1440 }
 0x84b   :  { %v1196_v1 = vadd.f32 1.0, %v1441_v0 }
 0x84d   :  { %1442 = vrcp.f32 %v1196_v1  ;;  %v1187_v3 = vpop.f32.mrf.mxu0  ;;  %v1209_v43 = vand.u32 2147483648, %v1196_v1  ;;  %v1207_v17 = vand.u32 2147483647, %v1196_v1  ;;  %vm1203_vm7 = vweird.f32 %v1196_v1 }
 0x84e   :  { %v1188_v4 = vadd.f32 %v1367_v60, %v1187_v3 }
 0x84f   :  { %v1210_v19 = vor.u32 1.1754944e-38, %v1209_v43  ;;  %vm1208_vm9 = vcmp.eq.f32.partialorder %v1207_v17, 8.507059e+37 }
 0x850   :  { %v1340_v5 = vmul.f32 -1.442695, %v1188_v4 }
 0x852   :  { %1444 = vpow2.f32 %v1340_v5 }
 0x853   :  { %v1443_v7 = vpop.eup %1442 }
 0x854   :  { %v1199_v11 = vmul.f32 %v1443_v7, %v1196_v1  ;;  %vm1204_vm6 = vweird.f32 %v1443_v7 }
 0x855   :  { %vm1205_vm8 = vmor %vm1203_vm7, %vm1204_vm6 }
 0x856   :  { %v1200_v12 = vsub.f32 1.0, %v1199_v11 }
 0x858   :  { %v1445_v15 = vpop.eup %1444  ;;  %v1201_v16 = vmul.f32 %v1443_v7, %v1200_v12 }
 0x859   :  { %v1197_v8 = vadd.f32 1.0, %v1445_v15 }
 0x85a   :  { %v1202_v18 = vadd.f32 %v1443_v7, %v1201_v16 }
 0x85b   :  { %1446 = vrcp.f32 %v1197_v8  ;;  %v1224_v26 = vand.u32 2147483648, %v1197_v8  ;;  %v1222_v28 = vand.u32 2147483647, %v1197_v8  ;;  %vm1218_vm11 = vweird.f32 %v1197_v8 }
 0x85c   :  { %v1206_v20 = vsel %vm1205_vm8, %v1443_v7, %v1202_v18 }
 0x85d   :  { %v1211_v21 = vsel %vm1208_vm9, %v1210_v19, %v1206_v20  ;;  %v1225_v30 = vor.u32 1.1754944e-38, %v1224_v26  ;;  %vm1223_vm13 = vcmp.eq.f32.partialorder %v1222_v28, 8.507059e+37 }
 0x85e   :  { %v1228_v49 = vmul.f32 %v1211_v21, %v1185_v62 }
 0x860   :  { %v1230_v22 = vadd.f32 %v1228_v49, %v2008_v13 }
 0x861   :  { %v1447_v23 = vpop.eup %1446 }
 0x862   :  { %v1214_v24 = vmul.f32 %v1447_v23, %v1197_v8  ;;  %1234 = vrot.lane.b32.xlu1 %v1230_v22, %s1607_s8  ;;  %vm1219_vm10 = vweird.f32 %v1447_v23 }
 0x863   :  { %vm1220_vm12 = vmor %vm1218_vm11, %vm1219_vm10 }
 0x864   :  { %v1215_v25 = vsub.f32 1.0, %v1214_v24 }
 0x866   :  { %v1216_v27 = vmul.f32 %v1447_v23, %v1215_v25 }
 0x868   :  { %v1217_v29 = vadd.f32 %v1447_v23, %v1216_v27 }
 0x86a   :  { %v1221_v6 = vsel %vm1220_vm12, %v1447_v23, %v1217_v29 }
 0x86b   :  { %v1226_v2 = vsel %vm1223_vm13, %v1225_v30, %v1221_v6 }
 0x86c   :  { %v1229_v31 = vmul.f32 %v1226_v2, %v1188_v4 }
 0x86e   :  { %v1231_v32 = vadd.f32 %v1229_v31, %v2013_v57 }
 0x870   :  { %1236 = vrot.lane.b32.xlu2 %v1231_v32, %s1607_s8 }
 0x8ca   :  { %v1237_v13 = vpop.permute.xlu2 %1236 }
 0x8cb   :  { %v1241_v14 = vmul.f32 %v1237_v13, %v1778_v10 }
 0x8cd   :  { %v1243_v33 = vsel %vm149_vm1, %v1231_v32, %v1241_v14 }
 0x8ce   :  { %1246 = vst.msk [vmem:[#allocation11 + $0x8] sm:$0xff] %vm1244_vm14, %v1243_v33 }
 0x8d4   :  { %v1235_v34 = vpop.permute.xlu1 %1234 }
 0x8d5   :  { %v1240_v35 = vmul.f32 %v1235_v34, %v1774_v9 }
 0x8d7   :  { %v1242_v57 = vsel %vm149_vm1, %v1230_v22, %v1240_v35 }
 0x8d8   :  { %1245 = vst.msk [vmem:[#allocation11] sm:$0xff] %vm1244_vm14, %v1242_v57 }
 0x8d9   :  { %1259 = dma.vmem_to_hbm [thread:$0]  %s1252_s15, 256, %s1254_s19, [#allocation4], %s1605_s30, %s1605_s30, %s1606_s5  }
 0x8da   :  { %1598 = dma.done.wait [#allocation4], 256  }
 0x8db   :  { %1599 = vsyncadd [#allocation4], 4294967040 }
 0x8dc   :  { %1264 = vsyncpa [#allocation3], 1 }
 0x8dd   :  { %1265 = vsyncpa [#allocation6], 1 }
 0x8de   :  { %1266 = vsyncpa [#allocation9], 1 }
 0x8df   :  { %1267 = vsyncpa [#allocation4], 1 }

</bundles_post_ra>
